<compile_context>
chip_gen: v7x
topology: tpu7x:2x2x1
jax: 0.10.0
libtpu: 0.0.40
codegen_flags: <defaults>
</compile_context>

<pallas_src>
import jax
import jax.numpy as jnp
from jax.experimental import pallas as pl
from jax.experimental.pallas import tpu as pltpu


TILE_B_MAX = 512  # upper bound on batch rows per grid step


def _head_kernel(text_ref, def_ref,        # [TB,1024] bf16 activation tiles
                 wt_ref, wd_ref,           # folded branch weights [1024,128] bf16
                 bdelta_ref,               # b_text_eff - b_def_eff   [1,128] f32
                 sw_ref, sb_ref,           # final layer row [1,128] f32, bias [1,1] f32
                 y_ref):                   # output tile [TB,1] f32
    # One MXU matmul per branch: bf16 x bf16 inputs, f32 accumulation.
    t = jnp.dot(text_ref[...], wt_ref[...], preferred_element_type=jnp.float32)
    d = jnp.dot(def_ref[...], wd_ref[...], preferred_element_type=jnp.float32)

    # L1 distance (biases folded into a single delta) + final 128->1 linear
    # done on VPU/XLU (no MXU push for a 1-lane output).
    dist = jnp.abs(t - d + bdelta_ref[...])                        # [TB,128] f32
    logit = jnp.sum(dist * sw_ref[...], axis=-1, keepdims=True) + sb_ref[...]
    y_ref[...] = jax.nn.sigmoid(logit)                             # [TB,1]


def _choose_tile_b(B, max_tile=TILE_B_MAX):
    """Largest (8,·)-legal batch tile <= max_tile that still gives the 1-D
    'parallel' grid at least 2 steps (keeps both v7x TensorCores busy)."""
    if B <= 8:
        return B                                   # single block == full dim
    if B <= 2 * max_tile:
        half = pl.cdiv(B, 2)
        return min(max_tile, ((half + 7) // 8) * 8)
    return max_tile


def fold_params(params):
    """Fold the two 4-layer affine stacks into single affine maps (done once,
    outside the hot path).  Weights -> bf16 (MXU-native with bf16 activations),
    the folded bias delta and the final layer stay f32."""
    (tw1, tb1, tw2, tb2, tw3, tb3, tw4, tb4,
     dw1, db1, dw2, db2, dw3, db3, dw4, db4, sw, sb) = params

    def fold(w1, b1, w2, b2, w3, b3, w4, b4):
        w_eff = w1 @ w2 @ w3 @ w4                              # [1024,128] f32
        b_eff = ((b1 @ w2 + b2) @ w3 + b3) @ w4 + b4           # [1,128]    f32
        return w_eff, b_eff

    wt, bt = fold(tw1, tb1, tw2, tb2, tw3, tb3, tw4, tb4)
    wd, bd = fold(dw1, db1, dw2, db2, dw3, db3, dw4, db4)
    b_delta = (bt - bd).astype(jnp.float32)                    # [1,128]
    return (wt.astype(jnp.bfloat16), wd.astype(jnp.bfloat16), b_delta,
            sw.T.astype(jnp.float32),                          # [1,128]
            sb.astype(jnp.float32))                            # [1,1]


def disambiguator_head(text_emb, def_emb, folded, max_tile_b=TILE_B_MAX):
    """text_emb, def_emb: [B, 1024] bfloat16 (cast at the producer, NOT here —
    a wrapper-side astype would add a full extra HBM read/write pass).
    Returns y: [B] float32."""
    wt, wd, b_delta, sw_row, sb = folded
    B, H = text_emb.shape
    if H != 1024:
        raise ValueError(f"expected 1024-d embeddings, got {H}")
    if text_emb.dtype != jnp.bfloat16 or def_emb.dtype != jnp.bfloat16:
        raise ValueError("embeddings must be produced in bfloat16 upstream")

    tile_b = _choose_tile_b(B, max_tile_b)
    n_tiles = pl.cdiv(B, tile_b)          # ragged last block handled by Pallas
    const = lambda i: (0, 0)              # weights: same block every step (VMEM-resident)

    y2d = pl.pallas_call(
        _head_kernel,
        out_shape=jax.ShapeDtypeStruct((B, 1), jnp.float32),
        grid_spec=pltpu.PrefetchScalarGridSpec(
            num_scalar_prefetch=0,
            grid=(n_tiles,),
            in_specs=[
                pl.BlockSpec((tile_b, 1024), lambda i: (i, 0)),   # text tile (bf16)
                pl.BlockSpec((tile_b, 1024), lambda i: (i, 0)),   # def tile  (bf16)
                pl.BlockSpec((1024, 128), const),                 # W_text_eff (bf16)
                pl.BlockSpec((1024, 128), const),                 # W_def_eff  (bf16)
                pl.BlockSpec((1, 128), const),                    # b_delta    (f32)
                pl.BlockSpec((1, 128), const),                    # sigm weight row
                pl.BlockSpec((1, 1), const),                      # sigm bias
            ],
            out_specs=pl.BlockSpec((tile_b, 1), lambda i: (i, 0)),
        ),
        compiler_params=pltpu.CompilerParams(
            dimension_semantics=("parallel",),   # shards batch over both TCs on v7x
            vmem_limit_bytes=32 << 20,           # actual footprint ~5 MiB at tile 512
        ),
    )(text_emb, def_emb, wt, wd, b_delta, sw_row, sb)

    # torch: .permute(1, 0).squeeze(0)  ->  [B, 1] -> [B]
    return y2d[:, 0]


def init_params(key):
    """Deterministic init matching the torch Linear layer shapes.
    Stored as [in, out] so y = x @ W + b (== torch Linear)."""
    dims = [(1024, 512), (512, 256), (256, 128), (128, 128)]
    keys = jax.random.split(key, 2 * len(dims) + 1)
    params = []

    def make_linear(k, fan_in, fan_out):
        bound = 1.0 / jnp.sqrt(fan_in)
        kw, kb = jax.random.split(k)
        w = jax.random.uniform(kw, (fan_in, fan_out), jnp.float32, -bound, bound)
        b = jax.random.uniform(kb, (1, fan_out), jnp.float32, -bound, bound)
        return w, b

    for i, (fi, fo) in enumerate(dims):                      # text branch
        params += list(make_linear(keys[i], fi, fo))
    for i, (fi, fo) in enumerate(dims):                      # definition branch
        params += list(make_linear(keys[len(dims) + i], fi, fo))
    params += list(make_linear(keys[-1], 128, 1))            # sigm_linear_1
    return tuple(params)


def reference_layers(text_emb_f32, def_emb_f32, params):
    """Layer-by-layer f32 forward (mirrors the torch module at inference)."""
    (tw1, tb1, tw2, tb2, tw3, tb3, tw4, tb4,
     dw1, db1, dw2, db2, dw3, db3, dw4, db4, sw, sb) = params
    t = text_emb_f32
    for w, b in [(tw1, tb1), (tw2, tb2), (tw3, tb3), (tw4, tb4)]:
        t = t @ w + b
    d = def_emb_f32
    for w, b in [(dw1, db1), (dw2, db2), (dw3, db3), (dw4, db4)]:
        d = d @ w + b
    logit = jnp.abs(t - d) @ sw + sb
    return jax.nn.sigmoid(logit)[:, 0]


def reference_folded(text_emb, def_emb, folded):
    """Pure-JAX mirror of the kernel numerics (folded bf16 weights, bf16
    activations, f32 accumulation)."""
    wt, wd, b_delta, sw_row, sb = folded
    t = jnp.dot(text_emb, wt, preferred_element_type=jnp.float32)
    d = jnp.dot(def_emb, wd, preferred_element_type=jnp.float32)
    dist = jnp.abs(t - d + b_delta)
    logit = jnp.sum(dist * sw_row, axis=-1, keepdims=True) + sb
    return jax.nn.sigmoid(logit)[:, 0]


if __name__ == "__main__":
    key = jax.random.PRNGKey(0)
    k_par, k_text, k_def = jax.random.split(key, 3)

    # Deliberately NOT a multiple of the chosen tile: exercises the ragged
    # last block (no wrapper-side padding copy).  HIDDEN is fixed at 1024 by
    # the module's Linear layers.
    B = 300
    HIDDEN = 1024

    params = init_params(k_par)
    folded = fold_params(params)

    # Synthetic stand-ins for the BERT keyword / pooler embeddings.  The real
    # producer should emit bf16 directly (halves the HBM traffic the kernel
    # streams); here we materialize them in bf16 at the source.
    text_emb = jax.random.normal(k_text, (B, HIDDEN), jnp.float32).astype(jnp.bfloat16)
    def_emb = jax.random.normal(k_def, (B, HIDDEN), jnp.float32).astype(jnp.bfloat16)

    y = disambiguator_head(text_emb, def_emb, folded)
    y = jax.block_until_ready(y)
    assert y.shape == (B,)
    assert bool(jnp.all(jnp.isfinite(y)))

    # exact-ish numerical reference (same folded bf16 weights / bf16 inputs /
    # f32 accumulation)
    y_ref = reference_folded(text_emb, def_emb, folded)
    assert jnp.allclose(y, y_ref, atol=2e-3, rtol=2e-3), (y[:4], y_ref[:4])

    # sanity check vs the original layer-by-layer f32 forward (folding + bf16
    # weights/activations change FP rounding, so this check is looser)
    y_full = reference_layers(text_emb.astype(jnp.float32),
                              def_emb.astype(jnp.float32), params)
    assert jnp.allclose(y, y_full, atol=5e-2), (y[:4], y_full[:4])

    print("KERNEL_OK")
</pallas_src>

<mosaic_0001>
module attributes {stable_mosaic.version = 11 : i64} {
  func.func @_head_kernel(%arg0: i32, %arg1: memref<152x1024xbf16, #tpu.memory_space<vmem>>, %arg2: memref<152x1024xbf16, #tpu.memory_space<vmem>>, %arg3: memref<1024x128xbf16, #tpu.memory_space<vmem>>, %arg4: memref<1024x128xbf16, #tpu.memory_space<vmem>>, %arg5: memref<1x128xf32, #tpu.memory_space<vmem>>, %arg6: memref<1x128xf32, #tpu.memory_space<vmem>>, %arg7: memref<1x1xf32, #tpu.memory_space<vmem>>, %arg8: memref<152x1xf32, #tpu.memory_space<vmem>>) attributes {dimension_semantics = [#tpu.dimension_semantics<parallel>], iteration_bounds = array<i64: 2>, scalar_prefetch = 0 : i64, scratch_operands = 0 : i64, tpu.core_type = #tpu.core_type<tc>, window_params = [{transform_indices = @transform_0, window_bounds = array<i64: 152, 1024>}, {transform_indices = @transform_1, window_bounds = array<i64: 152, 1024>}, {pipeline_mode = #tpu.pipeline_mode<synchronous>, transform_indices = @transform_2, window_bounds = array<i64: 1024, 128>}, {pipeline_mode = #tpu.pipeline_mode<synchronous>, transform_indices = @transform_3, window_bounds = array<i64: 1024, 128>}, {pipeline_mode = #tpu.pipeline_mode<synchronous>, transform_indices = @transform_4, window_bounds = array<i64: 1, 128>}, {pipeline_mode = #tpu.pipeline_mode<synchronous>, transform_indices = @transform_5, window_bounds = array<i64: 1, 128>}, {pipeline_mode = #tpu.pipeline_mode<synchronous>, transform_indices = @transform_6, window_bounds = array<i64: 1, 1>}, {transform_indices = @transform_7, window_bounds = array<i64: 152, 1>}]} {
    %c0 = arith.constant 0 : index
    %c0_0 = arith.constant 0 : index
    %0 = vector.load %arg1[%c0, %c0_0] : memref<152x1024xbf16, #tpu.memory_space<vmem>>, vector<152x1024xbf16>
    %c0_1 = arith.constant 0 : index
    %c0_2 = arith.constant 0 : index
    %1 = vector.load %arg3[%c0_1, %c0_2] : memref<1024x128xbf16, #tpu.memory_space<vmem>>, vector<1024x128xbf16>
    %cst = arith.constant dense<0.000000e+00> : vector<152x128xf32>
    %2 = tpu.matmul %0, %1, %cst {dimension_numbers = #tpu.dot_dimension_numbers<[1], [0], [0], [1], [0, 0, 1, 1], [], []>} : vector<152x1024xbf16>, vector<1024x128xbf16>, vector<152x128xf32> -> vector<152x128xf32>
    %c0_3 = arith.constant 0 : index
    %c0_4 = arith.constant 0 : index
    %3 = vector.load %arg2[%c0_3, %c0_4] : memref<152x1024xbf16, #tpu.memory_space<vmem>>, vector<152x1024xbf16>
    %c0_5 = arith.constant 0 : index
    %c0_6 = arith.constant 0 : index
    %4 = vector.load %arg4[%c0_5, %c0_6] : memref<1024x128xbf16, #tpu.memory_space<vmem>>, vector<1024x128xbf16>
    %cst_7 = arith.constant dense<0.000000e+00> : vector<152x128xf32>
    %5 = tpu.matmul %3, %4, %cst_7 {dimension_numbers = #tpu.dot_dimension_numbers<[1], [0], [0], [1], [0, 0, 1, 1], [], []>} : vector<152x1024xbf16>, vector<1024x128xbf16>, vector<152x128xf32> -> vector<152x128xf32>
    %6 = arith.subf %2, %5 : vector<152x128xf32>
    %c0_8 = arith.constant 0 : index
    %c0_9 = arith.constant 0 : index
    %7 = vector.load %arg5[%c0_8, %c0_9] : memref<1x128xf32, #tpu.memory_space<vmem>>, vector<1x128xf32>
    %8 = vector.broadcast %7 : vector<1x128xf32> to vector<152x128xf32>
    %9 = arith.addf %6, %8 : vector<152x128xf32>
    %10 = math.absf %9 : vector<152x128xf32>
    %c0_10 = arith.constant 0 : index
    %c0_11 = arith.constant 0 : index
    %11 = vector.load %arg6[%c0_10, %c0_11] : memref<1x128xf32, #tpu.memory_space<vmem>>, vector<1x128xf32>
    %12 = vector.broadcast %11 : vector<1x128xf32> to vector<152x128xf32>
    %13 = arith.mulf %10, %12 : vector<152x128xf32>
    %cst_12 = arith.constant dense<0.000000e+00> : vector<152xf32>
    %14 = vector.multi_reduction <add>, %13, %cst_12 [1] : vector<152x128xf32> to vector<152xf32>
    %15 = vector.shape_cast %14 : vector<152xf32> to vector<152x1xf32>
    %c0_13 = arith.constant 0 : index
    %c0_14 = arith.constant 0 : index
    %16 = vector.load %arg7[%c0_13, %c0_14] : memref<1x1xf32, #tpu.memory_space<vmem>>, vector<1x1xf32>
    %17 = vector.broadcast %16 : vector<1x1xf32> to vector<152x1xf32>
    %18 = arith.addf %15, %17 : vector<152x1xf32>
    %19 = arith.negf %18 : vector<152x1xf32>
    %20 = math.exp %19 : vector<152x1xf32>
    %cst_15 = arith.constant 1.000000e+00 : f32
    %21 = vector.broadcast %cst_15 : f32 to vector<152x1xf32>
    %22 = arith.addf %21, %20 : vector<152x1xf32>
    %23 = arith.divf %21, %22 : vector<152x1xf32>
    %c0_16 = arith.constant 0 : index
    %c0_17 = arith.constant 0 : index
    %24 = vector.load %arg8[%c0_16, %c0_17] : memref<152x1xf32, #tpu.memory_space<vmem>>, vector<152x1xf32>
    tpu.vector_store %arg8[%c0_16, %c0_17], %23 {strides = array<i32>} : memref<152x1xf32, #tpu.memory_space<vmem>>, vector<152x1xf32>,
    return
  }
  func.func @transform_0(%arg0: i32) -> (i32, i32) {
    %c0_i32 = arith.constant 0 : i32
    %c0_i32_0 = arith.constant 0 : i32
    return %arg0, %c0_i32 : i32, i32
  }
  func.func @transform_1(%arg0: i32) -> (i32, i32) {
    %c0_i32 = arith.constant 0 : i32
    %c0_i32_0 = arith.constant 0 : i32
    return %arg0, %c0_i32 : i32, i32
  }
  func.func @transform_2(%arg0: i32) -> (i32, i32) {
    %c0_i32 = arith.constant 0 : i32
    %c0_i32_0 = arith.constant 0 : i32
    %c0_i32_1 = arith.constant 0 : i32
    return %c0_i32, %c0_i32_0 : i32, i32
  }
  func.func @transform_3(%arg0: i32) -> (i32, i32) {
    %c0_i32 = arith.constant 0 : i32
    %c0_i32_0 = arith.constant 0 : i32
    %c0_i32_1 = arith.constant 0 : i32
    return %c0_i32, %c0_i32_0 : i32, i32
  }
  func.func @transform_4(%arg0: i32) -> (i32, i32) {
    %c0_i32 = arith.constant 0 : i32
    %c0_i32_0 = arith.constant 0 : i32
    %c0_i32_1 = arith.constant 0 : i32
    return %c0_i32, %c0_i32_0 : i32, i32
  }
  func.func @transform_5(%arg0: i32) -> (i32, i32) {
    %c0_i32 = arith.constant 0 : i32
    %c0_i32_0 = arith.constant 0 : i32
    %c0_i32_1 = arith.constant 0 : i32
    return %c0_i32, %c0_i32_0 : i32, i32
  }
  func.func @transform_6(%arg0: i32) -> (i32, i32) {
    %c0_i32 = arith.constant 0 : i32
    %c0_i32_0 = arith.constant 0 : i32
    %c0_i32_1 = arith.constant 0 : i32
    return %c0_i32, %c0_i32_0 : i32, i32
  }
  func.func @transform_7(%arg0: i32) -> (i32, i32) {
    %c0_i32 = arith.constant 0 : i32
    %c0_i32_0 = arith.constant 0 : i32
    return %arg0, %c0_i32 : i32, i32
  }
}

</mosaic_0001>

<bundles_post_ra>
// kernel: tpu_custom_call.1
= control target key start
LH: loop header
LB: loop body
LE: loop exit
PB: predicated region body
PF: predicated region fallthrough
CT: control target
= control target key end

     0   :  { %s5735_s0 = inlined_call_operand.hbm [shape: bf16[300,1024], index: 0, kind: input, shape index: {}]   ;;  %s5736_s1 = inlined_call_operand.hbm [shape: bf16[300,1024], index: 1, kind: input, shape index: {}]   ;;  %s5737_s2 = inlined_call_operand.hbm [shape: bf16[1024,128], index: 2, kind: input, shape index: {}]   ;;  %s5738_s3 = inlined_call_operand.hbm [shape: bf16[1024,128], index: 3, kind: input, shape index: {}]   ;;  %s5739_s4 = inlined_call_operand.vmem [shape: f32[1,128], index: 4, kind: input, shape index: {}]   ;;  %s5740_s5 = inlined_call_operand.vmem [shape: f32[1,128], index: 5, kind: input, shape index: {}]   ;;  %s5741_s6 = inlined_call_operand.<no memory space> [shape: f32[1,1], index: 6, kind: input, shape index: {}]   ;;  %s5742_s7 = inlined_call_operand.vmem [shape: f32[300,1], index: 7, kind: output, shape index: {}]  }
   0x1   :  { %v12_v0 = vstv %s5741_s6 }
   0x2   :  { %13 = vst [vmem:[#allocation2] sm:$0x1] %v12_v0 }
   0x3   :  { %14 = vsyncpa [#allocation4], 0 }
   0x4   :  { %16 = vsyncpa [#allocation4 + $0x1], 0 }
   0x5   :  { %17 = vsyncpa [#allocation6], 0 }
   0x6   :  { %19 = vsyncpa [#allocation6 + $0x1], 0 }
   0x7   :  { %20 = vsyncpa [#allocation9], 0  ;;  %s5068_s26 = smov 0   ;;  %s5070_s27 = smov 0  }
   0x8   :  { %s5072_s28 = smov 0   ;;  %s5074_s29 = smov 0  }
   0x9 LB: > { %s5087_s6 = sadd.s32 4294967295, %s5015_s29   ;;  %p46_p0 = scmp.ne.s32.totalorder %s5007_s27, %s5003_s26  ;;  %s5015_s29 = sphi %s5074_s29, %s5759_s29   ;;  %s5011_s28 = sphi %s5072_s28, %s5758_s28   ;;  %s5007_s27 = sphi %s5070_s27, %s5757_s27   ;;  %s5003_s26 = sphi %s5068_s26, %s5756_s26  }
   0xa   : > { %p5743_p1 = scmp.eq.s32.totalorder %s5087_s6, 0  ;;  %p3623_p2 = scmp.ge.s32.totalorder %s5015_s29, 1 }
   0xb   : > { %p214_p3 = scmp.lt.s32.totalorder %s5015_s29, 3  ;;  %s5017_s9 = smov [#allocation7]  }
   0xc   : > { %p5095_p4 = por %p5743_p1, %p46_p0  ;;  %s226_s10 = sshll.u32 %s5017_s9, 4  ;;  %s227_s10 = int_to_ptr.vmem [resolvable:$true] %s226_s10 }
   0xd   : > { %p5099_p5 = pnand %p3623_p2, %p214_p3  ;;  %s5018_s12 = smov [#allocation8]  }
   0xe   : > { %s5746_s30 = scalar_select %p5095_p4, 1, 0 }
   0xf   : > { %s5747_s8 = scalar_select %p5099_p5, 1, 0 }
  0x10   : > { %p4576_p6 = pneg %p5099_p5  ;;  %s239_s13 = sshll.u32 %s5018_s12, 4  ;;  %s5111_s13 = int_to_ptr.vmem [resolvable:$true] %s239_s13 }
  0x11   : > { %s4853_s16 = scalar_lea.hbm %s5737_s2, 8192 }
  0x12   : > { %p5107_p7 = pnand %p4576_p6, %p5743_p1  ;;  %p4854_p8 = scmp.ne.s32.totalorder %s5737_s2, %s4853_s16 }
  0x13   : > { %p4860_p12 = scmp.lt.u32.totalorder %s4853_s16, %s5737_s2 }
  0x14   : > { %p4855_p9 = pneg %p5107_p7 }
  0x16   : > { %p4856_p10 = pnand %p4855_p9, %p4854_p8 }
  0x18   : > { %p4857_p11 = pneg %p4856_p10 }
  0x1a   : > { %p4862_p13 = pnand %p4860_p12, %p4857_p11 }
  0x1c   : > { %4865 = shalt.err (!%p4862_p13)
}
  0x1d   : > { %s4866_s21 = scalar_lea.vmem %s227_s10, 8192  ;;  %p4874_p6 = scmp.lt.s32.totalorder %s227_s10, %s227_s10 }
  0x1e   : > { %p4867_p0 = scmp.ne.s32.totalorder %s227_s10, %s4866_s21  ;;  %p4875_p1 = scmp.lt.s32.totalorder %s4866_s21, %s4866_s21 }
  0x20   : > { %p4869_p2 = pnand %p4867_p0, %p4855_p9  ;;  %p4876_p4 = por %p4875_p1, %p4874_p6 }
  0x22   : > { %p4870_p3 = pneg %p4869_p2 }
  0x24   : > { %p4877_p5 = pnand %p4876_p4, %p4870_p3 }
  0x26   : > { %4880 = shalt.err (!%p4877_p5)
}
  0x27   : > { %s5019_s22 = smov 64   ;;  %s5020_s23 = smov 4  }
  0x28   : > { %4579 = dma.hbm_to_vmem [thread:$0]  (!%p5107_p7), %s5737_s2, 8192, %s227_s10, [#allocation6], %s5019_s22, %s5019_s22, %s5020_s23  }
  0x29   : > { %s4881_s12 = scalar_lea.hbm %s5738_s3, 8192 }
  0x2a   : > { %p4882_p8 = scmp.ne.s32.totalorder %s5738_s3, %s4881_s12  ;;  %p4888_p5 = scmp.lt.u32.totalorder %s4881_s12, %s5738_s3 }
  0x2c   : > { %p4884_p1 = pnand %p4882_p8, %p4855_p9 }
  0x2e   : > { %p4885_p4 = pneg %p4884_p1 }
  0x30   : > { %p4890_p10 = pnand %p4888_p5, %p4885_p4 }
  0x32   : > { %4893 = shalt.err (!%p4890_p10)
}
  0x33   : > { %s4894_s10 = scalar_lea.vmem %s5111_s13, 8192  ;;  %p4902_p0 = scmp.lt.s32.totalorder %s5111_s13, %s5111_s13 }
  0x34   : > { %p4895_p11 = scmp.ne.s32.totalorder %s5111_s13, %s4894_s10  ;;  %p4903_p2 = scmp.lt.s32.totalorder %s4894_s10, %s4894_s10 }
  0x36   : > { %p4897_p12 = pnand %p4895_p11, %p4855_p9  ;;  %p4904_p3 = por %p4903_p2, %p4902_p0 }
  0x38   : > { %p4898_p13 = pneg %p4897_p12 }
  0x3a   : > { %p4905_p6 = pnand %p4904_p3, %p4898_p13 }
  0x3c   : > { %4908 = shalt.err (!%p4905_p6)
}
  0x3d   : > { %4582 = dma.hbm_to_vmem [thread:$0]  (!%p5107_p7), %s5738_s3, 8192, %s5111_s13, [#allocation9], %s5019_s22, %s5019_s22, %s5020_s23  }
  0x3e   : > { %s5161_s20 = sadd.s32 1, %s5015_s29   ;;  %s33_s11 = sadd.s32 1, %s5011_s28 }
  0x3f   : > { %s30_s21 = ssub.s32 %s5015_s29, %s5161_s20  ;;  %p40_p9 = scmp.ne.s32.totalorder %s5011_s28, %s5007_s27 }
  0x40   : > { %p31_p8 = scmp.eq.s32.totalorder %s30_s21, 0  ;;  %p41_p1 = scmp.eq.s32.totalorder %s5015_s29, 0 }
  0x41   : > { %p4592_p4 = scmp.lt.s32.totalorder %s5015_s29, 2  ;;  %s262_s24 = sand.u32 1, %s5011_s28  }
  0x42   : > { %s5172_s25 = scalar_select %p31_p8, %s5011_s28, %s33_s11  }
  0x43   : > { %p42_p5 = por %p41_p1, %p40_p9  ;;  %s5174_s26 = smul.u32 608, %s262_s24 }
  0x44   : > { %s3951_s9 = smul.u32 9728, %s5015_s29  ;;  %s5191_s16 = scalar_lea.sflag [#allocation4], %s262_s24 }
  0x45   : > { %p5177_p10 = pnand %p4592_p4, %p42_p5  ;;  %s266_s14 = scalar_lea.vmem [#allocation3], %s5174_s26 }
  0x46   : > { %s5186_s23 = scalar_lea.hbm %s5735_s0, %s3951_s9  ;;  %s274_s15 = sshll.u32 %s266_s14, 4  ;;  %s5189_s15 = int_to_ptr.vmem [resolvable:$true] %s274_s15 }
  0x47   : > { %s4909_s17 = scalar_lea.hbm %s5186_s23, 9728  ;;  %p4911_p11 = pneg %p5177_p10 }
  0x48   : > { %p4910_p7 = scmp.ne.s32.totalorder %s5186_s23, %s4909_s17  ;;  %s4914_s19 = scalar_lea.hbm %s5735_s0, 19456 }
  0x49   : > { %p4915_p0 = scmp.lt.u32.totalorder %s5186_s23, %s5735_s0  ;;  %p4916_p2 = scmp.lt.u32.totalorder %s4914_s19, %s4909_s17 }
  0x4a   : > { %p4912_p12 = pnand %p4911_p11, %p4910_p7  ;;  %p4918_p6 = scmp.lt.u32.totalorder %s4909_s17, %s5186_s23 }
  0x4b   : > { %p4917_p3 = por %p4916_p2, %p4915_p0 }
  0x4c   : > { %p4913_p13 = pneg %p4912_p12 }
  0x4d   : > { %p4919_p9 = por %p4918_p6, %p4917_p3 }
  0x4f   : > { %p4920_p8 = pnand %p4919_p9, %p4913_p13 }
  0x51   : > { %4923 = shalt.err (!%p4920_p8)
}
  0x52   : > { %s4924_s24 = scalar_lea.vmem %s5189_s15, 9728  ;;  %s5021_s13 = smov [#allocation3]  }
  0x53   : > { %p4925_p1 = scmp.ne.s32.totalorder %s5189_s15, %s4924_s24  ;;  %s4929_s22 = sshll.u32 %s5021_s13, 4  ;;  %s4930_s22 = int_to_ptr.vmem [resolvable:$false] %s4929_s22 }
  0x54   : > { %s4931_s14 = scalar_lea.vmem %s4930_s22, 19456  ;;  %p4932_p7 = scmp.lt.s32.totalorder %s5189_s15, %s4930_s22 }
  0x55   : > { %p4927_p4 = pnand %p4925_p1, %p4911_p11  ;;  %p4933_p12 = scmp.lt.s32.totalorder %s4931_s14, %s4924_s24 }
  0x57   : > { %p4928_p5 = pneg %p4927_p4  ;;  %p4934_p0 = por %p4933_p12, %p4932_p7 }
  0x59   : > { %p4935_p2 = pnand %p4934_p0, %p4928_p5 }
  0x5b   : > { %4938 = shalt.err (!%p4935_p2)
}
  0x5c   : > { %s5022_s17 = smov 512   ;;  %s5023_s10 = smov 32  }
  0x5d   : > { %4586 = dma.hbm_to_vmem [thread:$0]  (!%p5177_p10), %s5186_s23, 9728, %s5189_s15, %s5191_s16, %s5022_s17, %s5022_s17, %s5023_s10  }
  0x5e   : > { %s284_s18 = sand.u32 1, %s5015_s29   ;;  %s5228_s21 = scalar_lea.hbm %s5736_s1, %s3951_s9 }
  0x5f   : > { %s288_s24 = scalar_lea.vmem [#allocation5], %s5174_s26  ;;  %s5233_s22 = scalar_lea.sflag [#allocation6], %s284_s18 }
  0x60   : > { %s296_s13 = sshll.u32 %s288_s24, 4  ;;  %s4939_s14 = scalar_lea.hbm %s5228_s21, 9728  ;;  %s5231_s13 = int_to_ptr.vmem [resolvable:$true] %s296_s13 }
  0x61   : > { %p4940_p13 = scmp.ne.s32.totalorder %s5228_s21, %s4939_s14  ;;  %s4944_s9 = scalar_lea.hbm %s5736_s1, 19456 }
  0x62   : > { %p4945_p9 = scmp.lt.u32.totalorder %s5228_s21, %s5736_s1  ;;  %p4946_p8 = scmp.lt.u32.totalorder %s4944_s9, %s4939_s14 }
  0x63   : > { %p4942_p3 = pnand %p4940_p13, %p4911_p11  ;;  %p4948_p4 = scmp.lt.u32.totalorder %s4939_s14, %s5228_s21 }
  0x64   : > { %p4947_p1 = por %p4946_p8, %p4945_p9 }
  0x65   : > { %p4943_p6 = pneg %p4942_p3 }
  0x66   : > { %p4949_p5 = por %p4948_p4, %p4947_p1 }
  0x68   : > { %p4950_p7 = pnand %p4949_p5, %p4943_p6 }
  0x6a   : > { %4953 = shalt.err (!%p4950_p7)
}
  0x6b   : > { %s4954_s26 = scalar_lea.vmem %s5231_s13, 9728  ;;  %s5024_s18 = smov [#allocation5]  }
  0x6c   : > { %p4955_p12 = scmp.ne.s32.totalorder %s5231_s13, %s4954_s26  ;;  %s4959_s19 = sshll.u32 %s5024_s18, 4  ;;  %s4960_s19 = int_to_ptr.vmem [resolvable:$false] %s4959_s19 }
  0x6d   : > { %s4961_s11 = scalar_lea.vmem %s4960_s19, 19456  ;;  %p4962_p13 = scmp.lt.s32.totalorder %s5231_s13, %s4960_s19 }
  0x6e   : > { %p4957_p0 = pnand %p4955_p12, %p4911_p11  ;;  %p4963_p3 = scmp.lt.s32.totalorder %s4961_s11, %s4954_s26 }
  0x70   : > { %p4958_p2 = pneg %p4957_p0  ;;  %p4964_p9 = por %p4963_p3, %p4962_p13 }
  0x72   : > { %p4965_p8 = pnand %p4964_p9, %p4958_p2 }
  0x74   : > { %4968 = shalt.err (!%p4965_p8)
}
  0x75   : > { %4589 = dma.hbm_to_vmem [thread:$0]  (!%p5177_p10), %s5228_s21, 9728, %s5231_s13, %s5233_s22, %s5022_s17, %s5022_s17, %s5023_s10  }
  0x76   : > { %p5750_p11 = scmp.ne.s32.totalorder %s5747_s8, 0 }
  0x77   : > { %s310_s24 = sand.u32 (!%p5750_p11), 1, %s5007_s27   ;;  %p5751_p6 = scmp.ne.s32.totalorder (!%p5750_p11), %s5746_s30, 0 }
  0x78   : > { %308 = sbr.rel (%p5750_p11) target bundleno = 882 (0x372), region = 48  ;;  %s311_s29 = scalar_lea.sflag (!%p5750_p11), [#allocation4], %s310_s24 }
  0x79   : > { %s4563_s14 = smul.u32 (!%p5750_p11), 608, %s310_s24 }
  0x7b   : > { %s5265_s23 = scalar_lea.vmem (!%p5750_p11), [#allocation3], %s4563_s14 }
  0x7f   : > { %4986 = dma.done.wait (%p5751_p6), %s311_s29, 9728  }
  0x80   : > { %4988 = vsyncadd (%p5751_p6), %s311_s29, 4294957568  ;;  %s319_s12 = sand.u32 1, %s5087_s6   ;;  %s5272_s17 = scalar_lea.vmem [#allocation5], %s4563_s14 }
  0x81   : > { %s320_s9 = scalar_lea.sflag [#allocation6], %s319_s12 }
  0x82   : > { %4990 = dma.done.wait (%p5751_p6), %s320_s9, 9728  }
  0x83   : > { %4992 = vsyncadd (%p5751_p6), %s320_s9, 4294957568  ;;  %p5752_p10 = scmp.eq.s32.totalorder %s5087_s6, 0 }
  0x85   : > { %4994 = dma.done.wait (%p5752_p10), [#allocation6], 8192   ;;  %p5753_p1 = pmov %p5752_p10 }
  0x87   : > { %4996 = vsyncadd (%p5753_p1), [#allocation6], 4294959104  ;;  %p5754_p4 = pmov %p5753_p1 }
  0x88   : > { %p5755_p5 = pmov %p5753_p1 }
  0x89   : > { %4998 = dma.done.wait (%p5754_p4), [#allocation9], 8192  }
  0x8a   : > { %5000 = vsyncadd (%p5755_p5), [#allocation9], 4294959104  ;;  %v4633_v1 = vld [vmem:[#allocation7 + $0x40] sm:$0xff]   ;;  %v4637_v5 = vld [vmem:[#allocation7 + $0x48] sm:$0xff]   ;;  %s369_s13 = smul.u32 19, %s5087_s6  ;;  %vm3492_vm0 = vcmask 7168  }
  0x8b   : > { %v4634_v2 = vld [vmem:[#allocation7 + $0xc0] sm:$0xff]   ;;  %3953 = vmatprep.subr.bf16.mxu0 %v4633_v1  ;;  %v4638_v6 = vld [vmem:[#allocation7 + $0xc8] sm:$0xff]   ;;  %v4641_v9 = vld [vmem:[#allocation7 + $0x50] sm:$0xff]  }
  0x8c   : > { %v4635_v3 = vld [vmem:[#allocation7] sm:$0xff]   ;;  %4029 = vmatprep.subr.bf16.mxu1 %v4634_v2  ;;  %v4639_v7 = vld [vmem:[#allocation7 + $0x8] sm:$0xff]   ;;  %v4642_v10 = vld [vmem:[#allocation7 + $0xd0] sm:$0xff]   ;;  %p370_p7 = scmp.lt.s32.totalorder %s369_s13, 37 }
  0x8d   : > { %v4636_v4 = vld [vmem:[#allocation7 + $0x80] sm:$0xff]   ;;  %3954 = vmatpush3.bf16.msra.mxu0 %v4635_v3  ;;  %v4640_v8 = vld [vmem:[#allocation7 + $0x88] sm:$0xff]   ;;  %v4643_v11 = vld [vmem:[#allocation7 + $0x10] sm:$0xff]  }
  0x8e   : > { %4030 = vmatpush3.bf16.msra.mxu1 %v4636_v4  ;;  %3955 = vmatprep.subr.bf16.mxu0 %v4637_v5  ;;  %v4644_v12 = vld [vmem:[#allocation7 + $0x90] sm:$0xff]   ;;  %v4645_v13 = vld [vmem:[#allocation7 + $0x58] sm:$0xff]   ;;  %v4649_v17 = vld [vmem:[#allocation7 + $0x60] sm:$0xff]   ;;  %s5761_s13 = smov (!%p370_p7, %s369_s13), 37 }
  0x8f   : > { %4031 = vmatprep.subr.bf16.mxu1 %v4638_v6  ;;  %v4646_v14 = vld [vmem:[#allocation7 + $0xd8] sm:$0xff]   ;;  %v4650_v18 = vld [vmem:[#allocation7 + $0xe0] sm:$0xff]   ;;  %v4653_v21 = vld [vmem:[#allocation7 + $0x68] sm:$0xff]   ;;  %s3634_s6 = sshll.u32 %s5761_s13, 3 }
  0x90   : > { %v4647_v15 = vld [vmem:[#allocation7 + $0x18] sm:$0xff]   ;;  %v4651_v19 = vld [vmem:[#allocation7 + $0x20] sm:$0xff]   ;;  %v4654_v22 = vld [vmem:[#allocation7 + $0xe8] sm:$0xff]   ;;  %s5670_s16 = scalar_lea.vmem %s5742_s7, %s3634_s6 }
  0x91   : > { %3956 = vmatpush3.bf16.msra.mxu0 %v4639_v7  ;;  %v4648_v16 = vld [vmem:[#allocation7 + $0x98] sm:$0xff]   ;;  %v4652_v20 = vld [vmem:[#allocation7 + $0xa0] sm:$0xff]   ;;  %v4655_v23 = vld [vmem:[#allocation7 + $0x28] sm:$0xff]  }
  0x92   : > { %4032 = vmatpush3.bf16.msra.mxu1 %v4640_v8  ;;  %3957 = vmatprep.subr.bf16.mxu0 %v4641_v9  ;;  %v4656_v24 = vld [vmem:[#allocation7 + $0xa8] sm:$0xff]   ;;  %v4657_v25 = vld [vmem:[#allocation7 + $0x70] sm:$0xff]   ;;  %v4661_v29 = vld [vmem:[#allocation7 + $0x78] sm:$0xff]  }
  0x93   : > { %4033 = vmatprep.subr.bf16.mxu1 %v4642_v10  ;;  %v4658_v26 = vld [vmem:[#allocation7 + $0xf0] sm:$0xff]   ;;  %v4662_v30 = vld [vmem:[#allocation7 + $0xf8] sm:$0xff]   ;;  %v376_v33 = vld [vmem:[%s5265_s23] sm:$0xff] }
  0x94   : > { %v4659_v27 = vld [vmem:[#allocation7 + $0x30] sm:$0xff]   ;;  %v4663_v31 = vld [vmem:[#allocation7 + $0x38] sm:$0xff]   ;;  %v380_v34 = vld [vmem:[%s5265_s23 + $0x20] sm:$0xff] }
  0x95   : > { %3958 = vmatpush3.bf16.msra.mxu0 %v4643_v11  ;;  %v4660_v28 = vld [vmem:[#allocation7 + $0xb0] sm:$0xff]   ;;  %v4664_v32 = vld [vmem:[#allocation7 + $0xb8] sm:$0xff]   ;;  %v377_v35 = vld [vmem:[%s5265_s23 + $0x8] sm:$0xff]  ;;  %v3635_v36 = vcombine.low %v376_v33, %v380_v34  ;;  %v3636_v37 = vcombine.high %v376_v33, %v380_v34 }
  0x96   : > { %4034 = vmatpush3.bf16.msra.mxu1 %v4644_v12  ;;  %3959 = vmatprep.subr.bf16.mxu0 %v4645_v13  ;;  %v381_v38 = vld [vmem:[%s5265_s23 + $0x28] sm:$0xff]  ;;  %v4665_v41 = vld [vmem:[#allocation7 + $0x140] sm:$0xff]   ;;  %v4673_v63 = vld [vmem:[#allocation7 + $0x150] sm:$0xff]  }
  0x97   : > { %4035 = vmatprep.subr.bf16.mxu1 %v4646_v14  ;;  %v3637_v39 = vcombine.low %v377_v35, %v381_v38  ;;  %v3638_v40 = vcombine.high %v377_v35, %v381_v38  ;;  %1384 = vmatprep.mubr.bf16.mxu0 %v3636_v37  ;;  %v4666_v42 = vld [vmem:[#allocation7 + $0x100] sm:$0xff]   ;;  %v385_v48 = vld [vmem:[%s5265_s23 + $0x48] sm:$0xff]  ;;  %v4674_v0 = vld [vmem:[#allocation7 + $0x110] sm:$0xff]  }
  0x98   : > { %v4667_v43 = vld [vmem:[#allocation7 + $0x1c0] sm:$0xff]   ;;  %v389_v49 = vld [vmem:[%s5265_s23 + $0x68] sm:$0xff]  ;;  %v4675_v1 = vld [vmem:[#allocation7 + $0x1d0] sm:$0xff]  }
  0x99   : > { %3960 = vmatpush3.bf16.msra.mxu0 %v4647_v15  ;;  %1496 = vmatprep.mubr.bf16.mxu1 %v3638_v40  ;;  %v4668_v44 = vld [vmem:[#allocation7 + $0x180] sm:$0xff]   ;;  %v3646_v50 = vcombine.high %v385_v48, %v389_v49  ;;  %v4669_v51 = vld [vmem:[#allocation7 + $0x148] sm:$0xff]   ;;  %v3645_v54 = vcombine.low %v385_v48, %v389_v49  ;;  %v4676_v9 = vld [vmem:[#allocation7 + $0x190] sm:$0xff]  }
  0x9a   : > { %4036 = vmatpush3.bf16.msra.mxu1 %v4648_v16  ;;  %3961 = vmatprep.subr.bf16.mxu0 %v4649_v17  ;;  %v384_v45 = vld [vmem:[%s5265_s23 + $0x40] sm:$0xff]  ;;  %v4670_v53 = vld [vmem:[#allocation7 + $0x108] sm:$0xff]   ;;  %v4677_v11 = vld [vmem:[#allocation7 + $0x158] sm:$0xff]  }
  0x9b   : > { %4037 = vmatprep.subr.bf16.mxu1 %v4650_v18  ;;  %v388_v46 = vld [vmem:[%s5265_s23 + $0x60] sm:$0xff]  ;;  %v4671_v55 = vld [vmem:[#allocation7 + $0x1c8] sm:$0xff]   ;;  %v4678_v13 = vld [vmem:[#allocation7 + $0x118] sm:$0xff]  }
  0x9c   : > { %v3644_v47 = vcombine.high %v384_v45, %v388_v46  ;;  %v3643_v52 = vcombine.low %v384_v45, %v388_v46  ;;  %v4672_v56 = vld [vmem:[#allocation7 + $0x188] sm:$0xff]   ;;  %v392_v57 = vld [vmem:[%s5265_s23 + $0x80] sm:$0xff]  ;;  %v4679_v14 = vld [vmem:[#allocation7 + $0x1d8] sm:$0xff]  }
  0x9d   : > { %3962 = vmatpush3.bf16.msra.mxu0 %v4651_v19  ;;  %v396_v58 = vld [vmem:[%s5265_s23 + $0xa0] sm:$0xff]  ;;  %v393_v59 = vld [vmem:[%s5265_s23 + $0x88] sm:$0xff]  ;;  %v4680_v16 = vld [vmem:[#allocation7 + $0x198] sm:$0xff]  }
  0x9e   : > { %4038 = vmatpush3.bf16.msra.mxu1 %v4652_v20  ;;  %3963 = vmatprep.subr.bf16.mxu0 %v4653_v21  ;;  %v397_v60 = vld [vmem:[%s5265_s23 + $0xa8] sm:$0xff]  ;;  %v3652_v61 = vcombine.high %v392_v57, %v396_v58  ;;  %v400_v2 = vld [vmem:[%s5265_s23 + $0xc0] sm:$0xff]  ;;  %v3651_v5 = vcombine.low %v392_v57, %v396_v58  ;;  %v4690_v40 = vld [vmem:[#allocation7 + $0x130] sm:$0xff]  }
  0x9f   : > { %4039 = vmatprep.subr.bf16.mxu1 %v4654_v22  ;;  %v3654_v62 = vcombine.high %v393_v59, %v397_v60  ;;  %v404_v3 = vld [vmem:[%s5265_s23 + $0xe0] sm:$0xff]  ;;  %v401_v4 = vld [vmem:[%s5265_s23 + $0xc8] sm:$0xff]  ;;  %v3653_v7 = vcombine.low %v393_v59, %v397_v60  ;;  %v4692_v46 = vld [vmem:[#allocation7 + $0x1b0] sm:$0xff]  }
  0xa0   : > { %v405_v6 = vld [vmem:[%s5265_s23 + $0xe8] sm:$0xff]  ;;  %v3660_v8 = vcombine.high %v400_v2, %v404_v3  ;;  %v408_v12 = vld [vmem:[%s5265_s23 + $0x100] sm:$0xff]  ;;  %v3659_v19 = vcombine.low %v400_v2, %v404_v3  ;;  %v4693_v48 = vld [vmem:[#allocation7 + $0x178] sm:$0xff]  }
  0xa1   : > { %3964 = vmatpush3.bf16.msra.mxu0 %v4655_v23  ;;  %v3662_v10 = vcombine.high %v401_v4, %v405_v6  ;;  %v412_v15 = vld [vmem:[%s5265_s23 + $0x120] sm:$0xff]  ;;  %v409_v17 = vld [vmem:[%s5265_s23 + $0x108] sm:$0xff]  ;;  %v3661_v21 = vcombine.low %v401_v4, %v405_v6 }
  0xa2   : > { %4040 = vmatpush3.bf16.msra.mxu1 %v4656_v24  ;;  %3965 = vmatprep.subr.bf16.mxu0 %v4657_v25  ;;  %v413_v18 = vld [vmem:[%s5265_s23 + $0x128] sm:$0xff]  ;;  %v4681_v20 = vld [vmem:[#allocation7 + $0x160] sm:$0xff]   ;;  %v3668_v22 = vcombine.high %v408_v12, %v412_v15  ;;  %v3667_v33 = vcombine.low %v408_v12, %v412_v15  ;;  %v378_v15 = vld [vmem:[%s5265_s23 + $0x10] sm:$0xff] }
  0xa3   : > { %4041 = vmatprep.subr.bf16.mxu1 %v4658_v26  ;;  %v4682_v23 = vld [vmem:[#allocation7 + $0x120] sm:$0xff]   ;;  %v3670_v24 = vcombine.high %v409_v17, %v413_v18  ;;  %v4687_v34 = vld [vmem:[#allocation7 + $0x1e8] sm:$0xff]   ;;  %v3669_v35 = vcombine.low %v409_v17, %v413_v18  ;;  %v379_v17 = vld [vmem:[%s5265_s23 + $0x18] sm:$0xff] }
  0xa4   : > { %v4683_v25 = vld [vmem:[#allocation7 + $0x1e0] sm:$0xff]   ;;  %v4688_v37 = vld [vmem:[#allocation7 + $0x1a8] sm:$0xff]   ;;  %v383_v18 = vld [vmem:[%s5265_s23 + $0x38] sm:$0xff] }
  0xa5   : > { %3966 = vmatpush3.bf16.msra.mxu0 %v4659_v27  ;;  %v4684_v26 = vld [vmem:[#allocation7 + $0x1a0] sm:$0xff]   ;;  %v429_v45 = vld [vmem:[%s5265_s23 + $0x1a8] sm:$0xff] }
  0xa6   : > { %4042 = vmatpush3.bf16.msra.mxu1 %v4660_v28  ;;  %3967 = vmatprep.subr.bf16.mxu0 %v4661_v29  ;;  %v416_v27 = vld [vmem:[%s5265_s23 + $0x140] sm:$0xff]  ;;  %v417_v29 = vld [vmem:[%s5265_s23 + $0x148] sm:$0xff] }
  0xa7   : > { %4043 = vmatprep.subr.bf16.mxu1 %v4662_v30  ;;  %v420_v28 = vld [vmem:[%s5265_s23 + $0x160] sm:$0xff]  ;;  %v421_v30 = vld [vmem:[%s5265_s23 + $0x168] sm:$0xff] }
  0xa8   : > { %v3678_v38 = vcombine.high %v417_v29, %v421_v30  ;;  %v3677_v49 = vcombine.low %v417_v29, %v421_v30  ;;  %v433_v57 = vld [vmem:[%s5265_s23 + $0x1c8] sm:$0xff]  ;;  %v4701_v58 = vld [vmem:[#allocation8 + $0x40] sm:$0xff]  }
  0xa9   : > { %3968 = vmatpush3.bf16.msra.mxu0 %v4663_v31  ;;  %v4685_v31 = vld [vmem:[#allocation7 + $0x168] sm:$0xff]   ;;  %v444_v2 = vld [vmem:[%s5265_s23 + $0x220] sm:$0xff] }
  0xaa   : > { %4044 = vmatpush3.bf16.msra.mxu1 %v4664_v32  ;;  %4105 = vmatprep.subr.bf16.mxu0 %v4665_v41  ;;  %v4686_v32 = vld [vmem:[#allocation7 + $0x128] sm:$0xff]   ;;  %v424_v41 = vld [vmem:[%s5265_s23 + $0x180] sm:$0xff] }
  0xab   : > { %4181 = vmatprep.subr.bf16.mxu1 %v4667_v43  ;;  %v428_v43 = vld [vmem:[%s5265_s23 + $0x1a0] sm:$0xff]  ;;  %v437_v59 = vld [vmem:[%s5265_s23 + $0x1e8] sm:$0xff] }
  0xac   : > { %1385 = vmatmul.mubr.bf16.vlgmr.msra.gmra.mrb[0].mxu0 %v3635_v36  ;;  %v3676_v36 = vcombine.high %v416_v27, %v420_v28  ;;  %v3683_v60 = vcombine.low %v424_v41, %v428_v43  ;;  %v441_v3 = vld [vmem:[%s5265_s23 + $0x208] sm:$0xff]  ;;  %v3693_v6 = vcombine.low %v433_v57, %v437_v59  ;;  %v4702_v29 = vld [vmem:[#allocation8] sm:$0xff]  }
  0xad   : > { %1497 = vmatmul.mubr.bf16.vlgmr.msra.gmra.mrb[0].mxu1 %v3637_v39  ;;  %4106 = vmatpush3.bf16.msra.mxu0 %v4666_v42  ;;  %v4689_v39 = vld [vmem:[#allocation7 + $0x170] sm:$0xff]   ;;  %v445_v4 = vld [vmem:[%s5265_s23 + $0x228] sm:$0xff]  ;;  %v4704_v30 = vld [vmem:[#allocation8 + $0x80] sm:$0xff]  }
  0xae   : > { %4182 = vmatpush3.bf16.msra.mxu1 %v4668_v44  ;;  %1392 = vmatprep.mubr.bf16.mxu0 %v3644_v47  ;;  %v4691_v42 = vld [vmem:[#allocation7 + $0x1f0] sm:$0xff]   ;;  %v425_v44 = vld [vmem:[%s5265_s23 + $0x188] sm:$0xff]  ;;  %v3675_v47 = vcombine.low %v416_v27, %v420_v28  ;;  %v3701_v12 = vcombine.low %v441_v3, %v445_v4  ;;  %v391_v27 = vld [vmem:[%s5265_s23 + $0x78] sm:$0xff]  ;;  %v3641_v28 = vcombine.low %v379_v17, %v383_v18 }
  0xaf   : > { %1504 = vmatprep.mubr.bf16.mxu1 %v3646_v50  ;;  %4107 = vmatprep.subr.bf16.mxu0 %v4669_v51  ;;  %v3684_v50 = vcombine.high %v424_v41, %v428_v43  ;;  %v3686_v51 = vcombine.high %v425_v44, %v429_v45  ;;  %v4709_v41 = vld [vmem:[#allocation8 + $0x50] sm:$0xff]  }
  0xb0   : > { %4183 = vmatprep.subr.bf16.mxu1 %v4671_v55  ;;  %v432_v55 = vld [vmem:[%s5265_s23 + $0x1c0] sm:$0xff] }
  0xb1   : > { %4108 = vmatpush3.bf16.msra.mxu0 %v4670_v53  ;;  %v4699_v53 = vld [vmem:[#allocation7 + $0x1f8] sm:$0xff]  }
  0xb2   : > { %4184 = vmatpush3.bf16.msra.mxu1 %v4672_v56  ;;  %4109 = vmatprep.subr.bf16.mxu0 %v4673_v63  ;;  %v436_v56 = vld [vmem:[%s5265_s23 + $0x1e0] sm:$0xff] }
  0xb3   : > { %4185 = vmatprep.subr.bf16.mxu1 %v4675_v1  ;;  %v3692_v63 = vcombine.high %v432_v55, %v436_v56  ;;  %v440_v1 = vld [vmem:[%s5265_s23 + $0x200] sm:$0xff] }
  0xb4   : > { %1393 = vmatmul.mubr.bf16.gmra.mrb[4].mxu0 %v3643_v52  ;;  %v4696_v52 = vld [vmem:[#allocation7 + $0x138] sm:$0xff]  }
  0xb5   : > { %1505 = vmatmul.mubr.bf16.gmra.mrb[4].mxu1 %v3645_v54  ;;  %1400 = vmatprep.mubr.bf16.mxu0 %v3652_v61  ;;  %v4700_v54 = vld [vmem:[#allocation7 + $0x1b8] sm:$0xff]   ;;  %v4703_v61 = vld [vmem:[#allocation8 + $0xc0] sm:$0xff]  }
  0xb6   : > { %1512 = vmatprep.mubr.bf16.mxu1 %v3654_v62  ;;  %4110 = vmatpush3.bf16.msra.mxu0 %v4674_v0  ;;  %v3685_v62 = vcombine.low %v425_v44, %v429_v45  ;;  %v3694_v0 = vcombine.high %v433_v57, %v437_v59  ;;  %v4717_v57 = vld [vmem:[#allocation8 + $0x60] sm:$0xff]  }
  0xb7   : > { %4186 = vmatpush3.bf16.msra.mxu1 %v4676_v9  ;;  %4111 = vmatprep.subr.bf16.mxu0 %v4677_v11  ;;  %v448_v9 = vld [vmem:[%s5265_s23 + $0x240] sm:$0xff]  ;;  %v3699_v11 = vcombine.low %v440_v1, %v444_v2 }
  0xb8   : > { %4187 = vmatprep.subr.bf16.mxu1 %v4679_v14  ;;  %v4719_v59 = vld [vmem:[#allocation8 + $0xe0] sm:$0xff]  }
  0xba   : > { %4112 = vmatpush3.bf16.msra.mxu0 %v4678_v13  ;;  %v3708_v13 = vcombine.high %v448_v9, %v448_v9 }
  0xbb   : > { %4188 = vmatpush3.bf16.msra.mxu1 %v4680_v16  ;;  %4113 = vmatprep.subr.bf16.mxu0 %v4681_v20  ;;  %v382_v16 = vld [vmem:[%s5265_s23 + $0x30] sm:$0xff] }
  0xbc   : > { %1401 = vmatmul.mubr.bf16.gmra.mrb[8].mxu0 %v3651_v5  ;;  %4189 = vmatprep.subr.bf16.mxu1 %v4683_v25  ;;  %v3691_v5 = vcombine.low %v432_v55, %v436_v56  ;;  %v387_v25 = vld [vmem:[%s5265_s23 + $0x58] sm:$0xff] }
  0xbd   : > { %1513 = vmatmul.mubr.bf16.gmra.mrb[8].mxu1 %v3653_v7  ;;  %1408 = vmatprep.mubr.bf16.mxu0 %v3660_v8  ;;  %v3700_v7 = vcombine.high %v440_v1, %v444_v2  ;;  %v3702_v8 = vcombine.high %v441_v3, %v445_v4  ;;  %v3649_v44 = vcombine.low %v387_v25, %v391_v27  ;;  %v407_v55 = vld [vmem:[%s5265_s23 + $0xf8] sm:$0xff]  ;;  %v4721_v1 = vld [vmem:[#allocation8 + $0x68] sm:$0xff]   ;;  %v410_v2 = vld [vmem:[%s5265_s23 + $0x110] sm:$0xff] }
  0xbe   : > { %1520 = vmatprep.mubr.bf16.mxu1 %v3662_v10  ;;  %4114 = vmatpush3.bf16.msra.mxu0 %v4682_v23  ;;  %v449_v10 = vld [vmem:[%s5265_s23 + $0x248] sm:$0xff]  ;;  %v386_v23 = vld [vmem:[%s5265_s23 + $0x50] sm:$0xff]  ;;  %v4716_v56 = vld [vmem:[#allocation8 + $0x98] sm:$0xff]  }
  0xbf   : > { %4190 = vmatpush3.bf16.msra.mxu1 %v4684_v26  ;;  %4115 = vmatprep.subr.bf16.mxu0 %v4685_v31  ;;  %v3710_v14 = vcombine.high %v449_v10, %v449_v10  ;;  %v3709_v20 = vcombine.low %v449_v10, %v449_v10  ;;  %v3639_v26 = vcombine.low %v378_v15, %v382_v16  ;;  %v414_v3 = vld [vmem:[%s5265_s23 + $0x130] sm:$0xff]  ;;  %v4723_v4 = vld [vmem:[#allocation8 + $0xe8] sm:$0xff]  }
  0xc0   : > { %4191 = vmatprep.subr.bf16.mxu1 %v4687_v34  ;;  %v4706_v34 = vld [vmem:[#allocation8 + $0x8] sm:$0xff]  }
  0xc2   : > { %4116 = vmatpush3.bf16.msra.mxu0 %v4686_v32  ;;  %v4705_v32 = vld [vmem:[#allocation8 + $0x48] sm:$0xff]  }
  0xc3   : > { %4192 = vmatpush3.bf16.msra.mxu1 %v4688_v37  ;;  %4117 = vmatprep.subr.bf16.mxu0 %v4689_v39  ;;  %v394_v37 = vld [vmem:[%s5265_s23 + $0x90] sm:$0xff]  ;;  %v395_v39 = vld [vmem:[%s5265_s23 + $0x98] sm:$0xff] }
  0xc4   : > { %1409 = vmatmul.mubr.bf16.gmra.mrb[12].mxu0 %v3659_v19  ;;  %4193 = vmatprep.subr.bf16.mxu1 %v4691_v42  ;;  %v3707_v19 = vcombine.low %v448_v9, %v448_v9  ;;  %v4711_v42 = vld [vmem:[#allocation8 + $0xd0] sm:$0xff]  }
  0xc5   : > { %1521 = vmatmul.mubr.bf16.gmra.mrb[12].mxu1 %v3661_v21  ;;  %1416 = vmatprep.mubr.bf16.mxu0 %v3668_v22  ;;  %v3640_v21 = vcombine.high %v378_v15, %v382_v16  ;;  %v3642_v22 = vcombine.high %v379_v17, %v383_v18  ;;  %v4725_v9 = vld [vmem:[#allocation8 + $0x70] sm:$0xff]   ;;  %v4729_v17 = vld [vmem:[#allocation8 + $0x78] sm:$0xff]  }
  0xc6   : > { %1528 = vmatprep.mubr.bf16.mxu1 %v3670_v24  ;;  %4118 = vmatpush3.bf16.msra.mxu0 %v4690_v40  ;;  %v390_v24 = vld [vmem:[%s5265_s23 + $0x70] sm:$0xff]  ;;  %v399_v40 = vld [vmem:[%s5265_s23 + $0xb8] sm:$0xff] }
  0xc7   : > { %4194 = vmatpush3.bf16.msra.mxu1 %v4692_v46  ;;  %4119 = vmatprep.subr.bf16.mxu0 %v4693_v48  ;;  %v3648_v31 = vcombine.high %v386_v23, %v390_v24  ;;  %v3647_v43 = vcombine.low %v386_v23, %v390_v24  ;;  %v3658_v46 = vcombine.high %v395_v39, %v399_v40  ;;  %v4712_v48 = vld [vmem:[#allocation8 + $0x90] sm:$0xff]   ;;  %v4732_v23 = vld [vmem:[#allocation8 + $0x38] sm:$0xff]  }
  0xc8   : > { %4195 = vmatprep.subr.bf16.mxu1 %v4699_v53  ;;  %v403_v53 = vld [vmem:[%s5265_s23 + $0xd8] sm:$0xff]  ;;  %v4726_v15 = vld [vmem:[#allocation8 + $0x30] sm:$0xff]  }
  0xc9   : > { %v4728_v16 = vld [vmem:[#allocation8 + $0xb0] sm:$0xff]   ;;  %v4736_v24 = vld [vmem:[#allocation8 + $0xb8] sm:$0xff]  }
  0xca   : > { %4120 = vmatpush3.bf16.msra.mxu0 %v4696_v52  ;;  %v406_v52 = vld [vmem:[%s5265_s23 + $0xf0] sm:$0xff] }
  0xcb   : > { %4196 = vmatpush3.bf16.msra.mxu1 %v4700_v54  ;;  %4257 = vmatprep.subr.bf16.mxu0 %v4701_v58  ;;  %v4714_v54 = vld [vmem:[#allocation8 + $0x18] sm:$0xff]   ;;  %v418_v18 = vld [vmem:[%s5265_s23 + $0x150] sm:$0xff] }
  0xcc   : > { %1417 = vmatmul.mubr.bf16.gmra.mrb[16].mxu0 %v3667_v33  ;;  %4333 = vmatprep.subr.bf16.mxu1 %v4703_v61  ;;  %v3650_v33 = vcombine.high %v387_v25, %v391_v27  ;;  %v4737_v25 = vld [vmem:[#allocation8 + $0x140] sm:$0xff]  }
  0xcd   : > { %1529 = vmatmul.mubr.bf16.gmra.mrb[16].mxu1 %v3669_v35  ;;  %1424 = vmatprep.mubr.bf16.mxu0 %v3676_v36  ;;  %v4707_v35 = vld [vmem:[#allocation8 + $0xc8] sm:$0xff]   ;;  %v4739_v27 = vld [vmem:[#allocation8 + $0x1c0] sm:$0xff]  }
  0xce   : > { %1536 = vmatprep.mubr.bf16.mxu1 %v3678_v38  ;;  %v4708_v36 = vld [vmem:[#allocation8 + $0x88] sm:$0xff]   ;;  %v398_v38 = vld [vmem:[%s5265_s23 + $0xb0] sm:$0xff] }
  0xcf   : > { %v3656_v45 = vcombine.high %v394_v37, %v398_v38  ;;  %v3655_v58 = vcombine.low %v394_v37, %v398_v38 }
  0xd4   : > { %1425 = vmatmul.mubr.bf16.gmra.mrb[20].mxu0 %v3675_v47  ;;  %v4710_v47 = vld [vmem:[#allocation8 + $0x10] sm:$0xff]  }
  0xd5   : > { %1537 = vmatmul.mubr.bf16.gmra.mrb[20].mxu1 %v3677_v49  ;;  %1432 = vmatprep.mubr.bf16.mxu0 %v3684_v50  ;;  %v4713_v49 = vld [vmem:[#allocation8 + $0x58] sm:$0xff]   ;;  %v402_v50 = vld [vmem:[%s5265_s23 + $0xd0] sm:$0xff] }
  0xd6   : > { %1544 = vmatprep.mubr.bf16.mxu1 %v3686_v51  ;;  %v4715_v51 = vld [vmem:[#allocation8 + $0xd8] sm:$0xff]   ;;  %v3664_v61 = vcombine.high %v402_v50, %v406_v52  ;;  %v3663_v10 = vcombine.low %v402_v50, %v406_v52 }
  0xd7   : > { %v447_v50 = vld [vmem:[%s5265_s23 + $0x238] sm:$0xff] }
  0xdc   : > { %1433 = vmatmul.mubr.bf16.gmra.mrb[24].mxu0 %v3683_v60  ;;  %v3657_v60 = vcombine.low %v395_v39, %v399_v40  ;;  %v434_v39 = vld [vmem:[%s5265_s23 + $0x1d0] sm:$0xff] }
  0xdd   : > { %1545 = vmatmul.mubr.bf16.gmra.mrb[24].mxu1 %v3685_v62  ;;  %1440 = vmatprep.mubr.bf16.mxu0 %v3692_v63  ;;  %v4718_v62 = vld [vmem:[#allocation8 + $0x20] sm:$0xff]   ;;  %v3666_v63 = vcombine.high %v403_v53, %v407_v55  ;;  %v438_v40 = vld [vmem:[%s5265_s23 + $0x1f0] sm:$0xff] }
  0xde   : > { %1552 = vmatprep.mubr.bf16.mxu1 %v3694_v0  ;;  %v4720_v0 = vld [vmem:[#allocation8 + $0xa0] sm:$0xff]  }
  0xe4   : > { %1441 = vmatmul.mubr.bf16.gmra.mrb[28].mxu0 %v3691_v5  ;;  %v411_v5 = vld [vmem:[%s5265_s23 + $0x118] sm:$0xff] }
  0xe5   : > { %1553 = vmatmul.mubr.bf16.gmra.mrb[28].mxu1 %v3693_v6  ;;  %1448 = vmatprep.mubr.bf16.mxu0 %v3700_v7  ;;  %v415_v6 = vld [vmem:[%s5265_s23 + $0x138] sm:$0xff]  ;;  %v4722_v7 = vld [vmem:[#allocation8 + $0x28] sm:$0xff]  }
  0xe6   : > { %1560 = vmatprep.mubr.bf16.mxu1 %v3702_v8  ;;  %v4724_v8 = vld [vmem:[#allocation8 + $0xa8] sm:$0xff]  }
  0xec   : > { %1449 = vmatmul.mubr.bf16.gmra.mrb[32].mxu0 %v3699_v11  ;;  %v4727_v11 = vld [vmem:[#allocation8 + $0xf0] sm:$0xff]  }
  0xed   : > { %1561 = vmatmul.mubr.bf16.gmra.mrb[32].mxu1 %v3701_v12  ;;  %1456 = vmatprep.mubr.bf16.mxu0 %v3708_v13  ;;  %v3665_v12 = vcombine.low %v403_v53, %v407_v55  ;;  %v3672_v13 = vcombine.high %v410_v2, %v414_v3  ;;  %v450_v55 = vld [vmem:[%s5265_s23 + $0x250] sm:$0xff] }
  0xee   : > { %1568 = vmatprep.mubr.bf16.mxu1 %v3710_v14  ;;  %v3674_v14 = vcombine.high %v411_v5, %v415_v6 }
  0xf4   : > { %1457 = vmatmul.mubr.bf16.gmra.mrb[36].mxu0 %v3707_v19  ;;  %v422_v19 = vld [vmem:[%s5265_s23 + $0x170] sm:$0xff] }
  0xf5   : > { %1569 = vmatmul.mubr.bf16.gmra.mrb[36].mxu1 %v3709_v20  ;;  %1608 = vmatprep.mubr.bf16.mxu0 %v3640_v21  ;;  %v4735_v20 = vld [vmem:[#allocation8 + $0xf8] sm:$0xff]  }
  0xf6   : > { %1720 = vmatprep.mubr.bf16.mxu1 %v3642_v22  ;;  %v419_v21 = vld [vmem:[%s5265_s23 + $0x158] sm:$0xff] }
  0xf7   : > { %v423_v22 = vld [vmem:[%s5265_s23 + $0x178] sm:$0xff] }
  0xfc   : > { %1609 = vmatmul.mubr.bf16.vlgmr.msra.gmra.mrb[40].mxu0 %v3639_v26  ;;  %v3671_v26 = vcombine.low %v410_v2, %v414_v3 }
  0xfd   : > { %1721 = vmatmul.mubr.bf16.vlgmr.msra.gmra.mrb[40].mxu1 %v3641_v28  ;;  %4258 = vmatpush3.bf16.msra.mxu0 %v4702_v29  ;;  %v3673_v28 = vcombine.low %v411_v5, %v415_v6  ;;  %v3680_v29 = vcombine.high %v418_v18, %v422_v19  ;;  %v1808_v5 = vld [vmem:[%s5272_s17 + $0x40] sm:$0xff] }
  0xfe   : > { %4334 = vmatpush3.bf16.msra.mxu1 %v4704_v30  ;;  %1616 = vmatprep.mubr.bf16.mxu0 %v3648_v31  ;;  %v3682_v30 = vcombine.high %v419_v21, %v423_v22  ;;  %v426_v31 = vld [vmem:[%s5265_s23 + $0x190] sm:$0xff]  ;;  %v1812_v6 = vld [vmem:[%s5272_s17 + $0x60] sm:$0xff] }
  0xff   : > { %1728 = vmatprep.mubr.bf16.mxu1 %v3650_v33  ;;  %4259 = vmatprep.subr.bf16.mxu0 %v4705_v32  ;;  %v430_v32 = vld [vmem:[%s5265_s23 + $0x1b0] sm:$0xff]  ;;  %v427_v33 = vld [vmem:[%s5265_s23 + $0x198] sm:$0xff] }
 0x100   : > { %4335 = vmatprep.subr.bf16.mxu1 %v4707_v35  ;;  %v3679_v35 = vcombine.low %v418_v18, %v422_v19  ;;  %v3688_v37 = vcombine.high %v426_v31, %v430_v32  ;;  %v4744_v18 = vld [vmem:[#allocation8 + $0x188] sm:$0xff]   ;;  %v1816_v19 = vld [vmem:[%s5272_s17 + $0x80] sm:$0xff] }
 0x101   : > { %4260 = vmatpush3.bf16.msra.mxu0 %v4706_v34  ;;  %v431_v34 = vld [vmem:[%s5265_s23 + $0x1b8] sm:$0xff] }
 0x102   : > { %4336 = vmatpush3.bf16.msra.mxu1 %v4708_v36  ;;  %4261 = vmatprep.subr.bf16.mxu0 %v4709_v41  ;;  %v3681_v36 = vcombine.low %v419_v21, %v423_v22  ;;  %v3690_v38 = vcombine.high %v427_v33, %v431_v34  ;;  %v435_v41 = vld [vmem:[%s5265_s23 + $0x1d8] sm:$0xff]  ;;  %v4745_v21 = vld [vmem:[#allocation8 + $0x150] sm:$0xff]   ;;  %v1817_v22 = vld [vmem:[%s5272_s17 + $0x88] sm:$0xff] }
 0x103   : > { %4337 = vmatprep.subr.bf16.mxu1 %v4711_v42  ;;  %v439_v42 = vld [vmem:[%s5265_s23 + $0x1f8] sm:$0xff] }
 0x104   : > { %1617 = vmatmul.mubr.bf16.gmra.mrb[44].mxu0 %v3647_v43  ;;  %v3687_v43 = vcombine.low %v426_v31, %v430_v32  ;;  %v3697_v52 = vcombine.low %v435_v41, %v439_v42  ;;  %v4749_v31 = vld [vmem:[#allocation8 + $0x158] sm:$0xff]  }
 0x105   : > { %1729 = vmatmul.mubr.bf16.gmra.mrb[44].mxu1 %v3649_v44  ;;  %1624 = vmatprep.mubr.bf16.mxu0 %v3656_v45  ;;  %v3689_v44 = vcombine.low %v427_v33, %v431_v34  ;;  %v3696_v45 = vcombine.high %v434_v39, %v438_v40  ;;  %v4751_v32 = vld [vmem:[#allocation8 + $0x1d8] sm:$0xff]   ;;  %v1824_v33 = vld [vmem:[%s5272_s17 + $0xc0] sm:$0xff] }
 0x106   : > { %1736 = vmatprep.mubr.bf16.mxu1 %v3658_v46  ;;  %4262 = vmatpush3.bf16.msra.mxu0 %v4710_v47  ;;  %v3698_v46 = vcombine.high %v435_v41, %v439_v42  ;;  %v442_v47 = vld [vmem:[%s5265_s23 + $0x210] sm:$0xff]  ;;  %v1828_v34 = vld [vmem:[%s5272_s17 + $0xe0] sm:$0xff] }
 0x107   : > { %4338 = vmatpush3.bf16.msra.mxu1 %v4712_v48  ;;  %4263 = vmatprep.subr.bf16.mxu0 %v4713_v49  ;;  %v446_v48 = vld [vmem:[%s5265_s23 + $0x230] sm:$0xff]  ;;  %v443_v49 = vld [vmem:[%s5265_s23 + $0x218] sm:$0xff]  ;;  %v4755_v41 = vld [vmem:[#allocation8 + $0x1e0] sm:$0xff]  }
 0x108   : > { %4339 = vmatprep.subr.bf16.mxu1 %v4715_v51  ;;  %v3695_v51 = vcombine.low %v434_v39, %v438_v40  ;;  %v3704_v53 = vcombine.high %v442_v47, %v446_v48  ;;  %v4753_v39 = vld [vmem:[#allocation8 + $0x160] sm:$0xff]  }
 0x10a   : > { %4264 = vmatpush3.bf16.msra.mxu0 %v4714_v54  ;;  %v3706_v54 = vcombine.high %v443_v49, %v447_v50 }
 0x10b   : > { %4340 = vmatpush3.bf16.msra.mxu1 %v4716_v56  ;;  %4265 = vmatprep.subr.bf16.mxu0 %v4717_v57  ;;  %v451_v56 = vld [vmem:[%s5265_s23 + $0x258] sm:$0xff]  ;;  %v3703_v57 = vcombine.low %v442_v47, %v446_v48  ;;  %v4757_v47 = vld [vmem:[#allocation8 + $0x168] sm:$0xff]  }
 0x10c   : > { %1625 = vmatmul.mubr.bf16.gmra.mrb[48].mxu0 %v3655_v58  ;;  %4341 = vmatprep.subr.bf16.mxu1 %v4719_v59  ;;  %v3705_v58 = vcombine.low %v443_v49, %v447_v50  ;;  %v3712_v59 = vcombine.high %v450_v55, %v450_v55  ;;  %v3713_v2 = vcombine.low %v451_v56, %v451_v56  ;;  %v4759_v48 = vld [vmem:[#allocation8 + $0x1e8] sm:$0xff]   ;;  %v1832_v49 = vld [vmem:[%s5272_s17 + $0x100] sm:$0xff] }
 0x10d   : > { %1737 = vmatmul.mubr.bf16.gmra.mrb[48].mxu1 %v3657_v60  ;;  %1632 = vmatprep.mubr.bf16.mxu0 %v3664_v61  ;;  %v3714_v60 = vcombine.high %v451_v56, %v451_v56  ;;  %v1800_v61 = vld [vmem:[%s5272_s17] sm:$0xff]  ;;  %v3803_v56 = vcombine.low %v1824_v33, %v1828_v34 }
 0x10e   : > { %1744 = vmatprep.mubr.bf16.mxu1 %v3666_v63  ;;  %4266 = vmatpush3.bf16.msra.mxu0 %v4718_v62  ;;  %v1804_v62 = vld [vmem:[%s5272_s17 + $0x20] sm:$0xff]  ;;  %v1801_v63 = vld [vmem:[%s5272_s17 + $0x8] sm:$0xff] }
 0x10f   : > { %4342 = vmatpush3.bf16.msra.mxu1 %v4720_v0  ;;  %4267 = vmatprep.subr.bf16.mxu0 %v4721_v1  ;;  %v1805_v0 = vld [vmem:[%s5272_s17 + $0x28] sm:$0xff]  ;;  %v3711_v1 = vcombine.low %v450_v55, %v450_v55  ;;  %v3780_v3 = vcombine.high %v1800_v61, %v1804_v62  ;;  %v1836_v50 = vld [vmem:[%s5272_s17 + $0x120] sm:$0xff]  ;;  %v4761_v55 = vld [vmem:[#allocation8 + $0x170] sm:$0xff]  }
 0x110   : > { %4343 = vmatprep.subr.bf16.mxu1 %v4723_v4  ;;  %v3782_v4 = vcombine.high %v1801_v63, %v1805_v0 }
 0x112   : > { %4268 = vmatpush3.bf16.msra.mxu0 %v4722_v7  ;;  %v3779_v7 = vcombine.low %v1800_v61, %v1804_v62  ;;  %v4762_v61 = vld [vmem:[#allocation8 + $0x130] sm:$0xff]  }
 0x113   : > { %4344 = vmatpush3.bf16.msra.mxu1 %v4724_v8  ;;  %4269 = vmatprep.subr.bf16.mxu0 %v4725_v9  ;;  %v1809_v8 = vld [vmem:[%s5272_s17 + $0x48] sm:$0xff]  ;;  %v4764_v62 = vld [vmem:[#allocation8 + $0x1b0] sm:$0xff]  }
 0x114   : > { %1633 = vmatmul.mubr.bf16.gmra.mrb[52].mxu0 %v3663_v10  ;;  %4345 = vmatprep.subr.bf16.mxu1 %v4727_v11  ;;  %v1813_v9 = vld [vmem:[%s5272_s17 + $0x68] sm:$0xff]  ;;  %v3781_v10 = vcombine.low %v1801_v63, %v1805_v0  ;;  %v4738_v11 = vld [vmem:[#allocation8 + $0x100] sm:$0xff]   ;;  %v4765_v63 = vld [vmem:[#allocation8 + $0x178] sm:$0xff]  }
 0x115   : > { %1745 = vmatmul.mubr.bf16.gmra.mrb[52].mxu1 %v3665_v12  ;;  %1640 = vmatprep.mubr.bf16.mxu0 %v3672_v13  ;;  %v4740_v12 = vld [vmem:[#allocation8 + $0x180] sm:$0xff]   ;;  %v3788_v13 = vcombine.high %v1808_v5, %v1812_v6  ;;  %v4771_v0 = vld [vmem:[#allocation8 + $0x1f8] sm:$0xff]  }
 0x116   : > { %1752 = vmatprep.mubr.bf16.mxu1 %v3674_v14  ;;  %4270 = vmatpush3.bf16.msra.mxu0 %v4726_v15  ;;  %v3790_v14 = vcombine.high %v1809_v8, %v1813_v9  ;;  %v4741_v15 = vld [vmem:[#allocation8 + $0x148] sm:$0xff]  }
 0x117   : > { %4346 = vmatpush3.bf16.msra.mxu1 %v4728_v16  ;;  %4271 = vmatprep.subr.bf16.mxu0 %v4729_v17  ;;  %v4743_v16 = vld [vmem:[#allocation8 + $0x1c8] sm:$0xff]  }
 0x118   : > { %4347 = vmatprep.subr.bf16.mxu1 %v4735_v20  ;;  %v4742_v17 = vld [vmem:[#allocation8 + $0x108] sm:$0xff]   ;;  %v1820_v20 = vld [vmem:[%s5272_s17 + $0xa0] sm:$0xff] }
 0x119   : > { %v3795_v40 = vcombine.low %v1816_v19, %v1820_v20 }
 0x11a   : > { %4272 = vmatpush3.bf16.msra.mxu0 %v4732_v23  ;;  %v1821_v23 = vld [vmem:[%s5272_s17 + $0xa8] sm:$0xff] }
 0x11b   : > { %4348 = vmatpush3.bf16.msra.mxu1 %v4736_v24  ;;  %4409 = vmatprep.subr.bf16.mxu0 %v4737_v25  ;;  %v4747_v24 = vld [vmem:[#allocation8 + $0x1d0] sm:$0xff]   ;;  %v3787_v25 = vcombine.low %v1808_v5, %v1812_v6  ;;  %v3797_v42 = vcombine.low %v1817_v22, %v1821_v23  ;;  %v1845_v5 = vld [vmem:[%s5272_s17 + $0x168] sm:$0xff]  ;;  %v4772_v6 = vld [vmem:[#allocation8 + $0x1b8] sm:$0xff]  }
 0x11c   : > { %1641 = vmatmul.mubr.bf16.gmra.mrb[56].mxu0 %v3671_v26  ;;  %4485 = vmatprep.subr.bf16.mxu1 %v4739_v27  ;;  %v3789_v26 = vcombine.low %v1809_v8, %v1813_v9  ;;  %v3796_v27 = vcombine.high %v1816_v19, %v1820_v20  ;;  %v1856_v19 = vld [vmem:[%s5272_s17 + $0x1c0] sm:$0xff] }
 0x11d   : > { %1753 = vmatmul.mubr.bf16.gmra.mrb[56].mxu1 %v3673_v28  ;;  %1648 = vmatprep.mubr.bf16.mxu0 %v3680_v29  ;;  %v3798_v28 = vcombine.high %v1817_v22, %v1821_v23  ;;  %v4746_v29 = vld [vmem:[#allocation8 + $0x110] sm:$0xff]   ;;  %v1860_v20 = vld [vmem:[%s5272_s17 + $0x1e0] sm:$0xff]  ;;  %v1861_v22 = vld [vmem:[%s5272_s17 + $0x1e8] sm:$0xff] }
 0x11e   : > { %1760 = vmatprep.mubr.bf16.mxu1 %v3682_v30  ;;  %v4748_v30 = vld [vmem:[#allocation8 + $0x190] sm:$0xff]  }
 0x124   : > { %1649 = vmatmul.mubr.bf16.gmra.mrb[60].mxu0 %v3679_v35  ;;  %v1825_v35 = vld [vmem:[%s5272_s17 + $0xc8] sm:$0xff] }
 0x125   : > { %1761 = vmatmul.mubr.bf16.gmra.mrb[60].mxu1 %v3681_v36  ;;  %1656 = vmatprep.mubr.bf16.mxu0 %v3688_v37  ;;  %v4750_v36 = vld [vmem:[#allocation8 + $0x118] sm:$0xff]   ;;  %v1829_v37 = vld [vmem:[%s5272_s17 + $0xe8] sm:$0xff] }
 0x126   : > { %1768 = vmatprep.mubr.bf16.mxu1 %v3690_v38  ;;  %v4752_v38 = vld [vmem:[#allocation8 + $0x198] sm:$0xff]  }
 0x12c   : > { %1657 = vmatmul.mubr.bf16.gmra.mrb[64].mxu0 %v3687_v43  ;;  %v3804_v43 = vcombine.high %v1824_v33, %v1828_v34  ;;  %v3835_v34 = vcombine.low %v1856_v19, %v1860_v20 }
 0x12d   : > { %1769 = vmatmul.mubr.bf16.gmra.mrb[64].mxu1 %v3689_v44  ;;  %1664 = vmatprep.mubr.bf16.mxu0 %v3696_v45  ;;  %v3806_v44 = vcombine.high %v1825_v35, %v1829_v37  ;;  %v4754_v45 = vld [vmem:[#allocation8 + $0x120] sm:$0xff]  }
 0x12e   : > { %1776 = vmatprep.mubr.bf16.mxu1 %v3698_v46  ;;  %v4756_v46 = vld [vmem:[#allocation8 + $0x1a0] sm:$0xff]  }
 0x134   : > { %1665 = vmatmul.mubr.bf16.gmra.mrb[68].mxu0 %v3695_v51  ;;  %v1833_v51 = vld [vmem:[%s5272_s17 + $0x108] sm:$0xff] }
 0x135   : > { %1777 = vmatmul.mubr.bf16.gmra.mrb[68].mxu1 %v3697_v52  ;;  %1672 = vmatprep.mubr.bf16.mxu0 %v3704_v53  ;;  %v4758_v52 = vld [vmem:[#allocation8 + $0x128] sm:$0xff]  }
 0x136   : > { %1784 = vmatprep.mubr.bf16.mxu1 %v3706_v54  ;;  %v1837_v53 = vld [vmem:[%s5272_s17 + $0x128] sm:$0xff] }
 0x137   : > { %v4760_v54 = vld [vmem:[#allocation8 + $0x1a8] sm:$0xff]   ;;  %v3813_v8 = vcombine.low %v1833_v51, %v1837_v53 }
 0x13c   : > { %1673 = vmatmul.mubr.bf16.gmra.mrb[72].mxu0 %v3703_v57  ;;  %v4763_v57 = vld [vmem:[#allocation8 + $0x1f0] sm:$0xff]  }
 0x13d   : > { %1785 = vmatmul.mubr.bf16.gmra.mrb[72].mxu1 %v3705_v58  ;;  %1680 = vmatprep.mubr.bf16.mxu0 %v3712_v59  ;;  %v3805_v58 = vcombine.low %v1825_v35, %v1829_v37  ;;  %v3812_v59 = vcombine.high %v1832_v49, %v1836_v50 }
 0x13e   : > { %1792 = vmatprep.mubr.bf16.mxu1 %v3714_v60  ;;  %v3814_v60 = vcombine.high %v1833_v51, %v1837_v53  ;;  %v1873_v51 = vld [vmem:[%s5272_s17 + $0x248] sm:$0xff] }
 0x144   : > { %1681 = vmatmul.mubr.bf16.gmra.mrb[76].mxu0 %v3711_v1  ;;  %v1840_v1 = vld [vmem:[%s5272_s17 + $0x140] sm:$0xff] }
 0x145   : > { %1793 = vmatmul.mubr.bf16.gmra.mrb[76].mxu1 %v3713_v2  ;;  %2808 = vmatprep.mubr.bf16.mxu0 %v3780_v3  ;;  %v1844_v2 = vld [vmem:[%s5272_s17 + $0x160] sm:$0xff]  ;;  %v4768_v3 = vld [vmem:[#allocation8 + $0x138] sm:$0xff]  }
 0x146   : > { %2920 = vmatprep.mubr.bf16.mxu1 %v3782_v4  ;;  %v1841_v4 = vld [vmem:[%s5272_s17 + $0x148] sm:$0xff]  ;;  %v3820_v9 = vcombine.high %v1840_v1, %v1844_v2 }
 0x14c   : > { %2809 = vmatmul.mubr.bf16.vlgmr.msra.gmra.mrb[80].mxu0 %v3779_v7  ;;  %v3811_v7 = vcombine.low %v1832_v49, %v1836_v50  ;;  %v1872_v49 = vld [vmem:[%s5272_s17 + $0x240] sm:$0xff] }
 0x14d   : > { %2921 = vmatmul.mubr.bf16.vlgmr.msra.gmra.mrb[80].mxu1 %v3781_v10  ;;  %4410 = vmatpush3.bf16.msra.mxu0 %v4738_v11  ;;  %v3822_v10 = vcombine.high %v1841_v4, %v1845_v5  ;;  %v1848_v11 = vld [vmem:[%s5272_s17 + $0x180] sm:$0xff] }
 0x14e   : > { %4486 = vmatpush3.bf16.msra.mxu1 %v4740_v12  ;;  %2816 = vmatprep.mubr.bf16.mxu0 %v3788_v13  ;;  %v1852_v12 = vld [vmem:[%s5272_s17 + $0x1a0] sm:$0xff]  ;;  %v1849_v13 = vld [vmem:[%s5272_s17 + $0x188] sm:$0xff] }
 0x14f   : > { %2928 = vmatprep.mubr.bf16.mxu1 %v3790_v14  ;;  %4411 = vmatprep.subr.bf16.mxu0 %v4741_v15  ;;  %v1853_v14 = vld [vmem:[%s5272_s17 + $0x1a8] sm:$0xff]  ;;  %v3819_v15 = vcombine.low %v1840_v1, %v1844_v2  ;;  %v3827_v23 = vcombine.low %v1848_v11, %v1852_v12 }
 0x150   : > { %4487 = vmatprep.subr.bf16.mxu1 %v4743_v16  ;;  %v3821_v16 = vcombine.low %v1841_v4, %v1845_v5  ;;  %v1802_v5 = vld [vmem:[%s5272_s17 + $0x10] sm:$0xff] }
 0x151   : > { %4412 = vmatpush3.bf16.msra.mxu0 %v4742_v17  ;;  %v3828_v17 = vcombine.high %v1848_v11, %v1852_v12  ;;  %v3851_v12 = vcombine.low %v1872_v49, %v1872_v49 }
 0x152   : > { %4488 = vmatpush3.bf16.msra.mxu1 %v4744_v18  ;;  %4413 = vmatprep.subr.bf16.mxu0 %v4745_v21  ;;  %v3830_v18 = vcombine.high %v1849_v13, %v1853_v14  ;;  %v1857_v21 = vld [vmem:[%s5272_s17 + $0x1c8] sm:$0xff] }
 0x153   : > { %4489 = vmatprep.subr.bf16.mxu1 %v4747_v24  ;;  %v3829_v24 = vcombine.low %v1849_v13, %v1853_v14 }
 0x154   : > { %2817 = vmatmul.mubr.bf16.gmra.mrb[84].mxu0 %v3787_v25  ;;  %v3836_v25 = vcombine.high %v1856_v19, %v1860_v20 }
 0x155   : > { %2929 = vmatmul.mubr.bf16.gmra.mrb[84].mxu1 %v3789_v26  ;;  %2824 = vmatprep.mubr.bf16.mxu0 %v3796_v27  ;;  %v3838_v26 = vcombine.high %v1857_v21, %v1861_v22  ;;  %v1864_v27 = vld [vmem:[%s5272_s17 + $0x200] sm:$0xff] }
 0x156   : > { %2936 = vmatprep.mubr.bf16.mxu1 %v3798_v28  ;;  %4414 = vmatpush3.bf16.msra.mxu0 %v4746_v29  ;;  %v1868_v28 = vld [vmem:[%s5272_s17 + $0x220] sm:$0xff] }
 0x157   : > { %4490 = vmatpush3.bf16.msra.mxu1 %v4748_v30  ;;  %4415 = vmatprep.subr.bf16.mxu0 %v4749_v31  ;;  %v1865_v30 = vld [vmem:[%s5272_s17 + $0x208] sm:$0xff] }
 0x158   : > { %4491 = vmatprep.subr.bf16.mxu1 %v4751_v32  ;;  %v1869_v31 = vld [vmem:[%s5272_s17 + $0x228] sm:$0xff] }
 0x15a   : > { %4416 = vmatpush3.bf16.msra.mxu0 %v4750_v36 }
 0x15b   : > { %4492 = vmatpush3.bf16.msra.mxu1 %v4752_v38  ;;  %4417 = vmatprep.subr.bf16.mxu0 %v4753_v39  ;;  %v3837_v38 = vcombine.low %v1857_v21, %v1861_v22  ;;  %v3844_v39 = vcombine.high %v1864_v27, %v1868_v28 }
 0x15c   : > { %2825 = vmatmul.mubr.bf16.gmra.mrb[88].mxu0 %v3795_v40  ;;  %4493 = vmatprep.subr.bf16.mxu1 %v4755_v41 }
 0x15d   : > { %2937 = vmatmul.mubr.bf16.gmra.mrb[88].mxu1 %v3797_v42  ;;  %2832 = vmatprep.mubr.bf16.mxu0 %v3804_v43  ;;  %v3846_v43 = vcombine.high %v1865_v30, %v1869_v31 }
 0x15e   : > { %2944 = vmatprep.mubr.bf16.mxu1 %v3806_v44  ;;  %4418 = vmatpush3.bf16.msra.mxu0 %v4754_v45 }
 0x15f   : > { %4494 = vmatpush3.bf16.msra.mxu1 %v4756_v46  ;;  %4419 = vmatprep.subr.bf16.mxu0 %v4757_v47 }
 0x160   : > { %4495 = vmatprep.subr.bf16.mxu1 %v4759_v48 }
 0x162   : > { %4420 = vmatpush3.bf16.msra.mxu0 %v4758_v52 }
 0x163   : > { %4496 = vmatpush3.bf16.msra.mxu1 %v4760_v54  ;;  %4421 = vmatprep.subr.bf16.mxu0 %v4761_v55  ;;  %v3843_v54 = vcombine.low %v1864_v27, %v1868_v28  ;;  %v1810_v27 = vld [vmem:[%s5272_s17 + $0x50] sm:$0xff] }
 0x164   : > { %2833 = vmatmul.mubr.bf16.gmra.mrb[92].mxu0 %v3803_v56  ;;  %4497 = vmatprep.subr.bf16.mxu1 %v4763_v57  ;;  %v1814_v28 = vld [vmem:[%s5272_s17 + $0x70] sm:$0xff] }
 0x165   : > { %2945 = vmatmul.mubr.bf16.gmra.mrb[92].mxu1 %v3805_v58  ;;  %2840 = vmatprep.mubr.bf16.mxu0 %v3812_v59  ;;  %v3845_v58 = vcombine.low %v1865_v30, %v1869_v31  ;;  %v3852_v59 = vcombine.high %v1872_v49, %v1872_v49  ;;  %v1811_v30 = vld [vmem:[%s5272_s17 + $0x58] sm:$0xff] }
 0x166   : > { %2952 = vmatprep.mubr.bf16.mxu1 %v3814_v60  ;;  %4422 = vmatpush3.bf16.msra.mxu0 %v4762_v61  ;;  %v1815_v31 = vld [vmem:[%s5272_s17 + $0x78] sm:$0xff] }
 0x167   : > { %4498 = vmatpush3.bf16.msra.mxu1 %v4764_v62  ;;  %4423 = vmatprep.subr.bf16.mxu0 %v4765_v63  ;;  %v3854_v63 = vcombine.high %v1873_v51, %v1873_v51 }
 0x168   : > { %4499 = vmatprep.subr.bf16.mxu1 %v4771_v0 }
 0x16a   : > { %4424 = vmatpush3.bf16.msra.mxu0 %v4768_v3 }
 0x16b   : > { %4500 = vmatpush3.bf16.msra.mxu1 %v4772_v6  ;;  %v1806_v6 = vld [vmem:[%s5272_s17 + $0x30] sm:$0xff] }
 0x16c   : > { %2841 = vmatmul.mubr.bf16.gmra.mrb[96].mxu0 %v3811_v7 }
 0x16d   : > { %2953 = vmatmul.mubr.bf16.gmra.mrb[96].mxu1 %v3813_v8  ;;  %2848 = vmatprep.mubr.bf16.mxu0 %v3820_v9  ;;  %v1803_v8 = vld [vmem:[%s5272_s17 + $0x18] sm:$0xff] }
 0x16e   : > { %2960 = vmatprep.mubr.bf16.mxu1 %v3822_v10  ;;  %v1807_v9 = vld [vmem:[%s5272_s17 + $0x38] sm:$0xff] }
 0x16f   : > { %v3786_v21 = vcombine.high %v1803_v8, %v1807_v9 }
 0x174   : > { %2849 = vmatmul.mubr.bf16.gmra.mrb[100].mxu0 %v3819_v15 }
 0x175   : > { %2961 = vmatmul.mubr.bf16.gmra.mrb[100].mxu1 %v3821_v16  ;;  %2856 = vmatprep.mubr.bf16.mxu0 %v3828_v17  ;;  %v3853_v16 = vcombine.low %v1873_v51, %v1873_v51  ;;  %v3784_v17 = vcombine.high %v1802_v5, %v1806_v6  ;;  %v1818_v51 = vld [vmem:[%s5272_s17 + $0x90] sm:$0xff] }
 0x176   : > { %2968 = vmatprep.mubr.bf16.mxu1 %v3830_v18 }
 0x17c   : > { %2857 = vmatmul.mubr.bf16.gmra.mrb[104].mxu0 %v3827_v23 }
 0x17d   : > { %2969 = vmatmul.mubr.bf16.gmra.mrb[104].mxu1 %v3829_v24  ;;  %2864 = vmatprep.mubr.bf16.mxu0 %v3836_v25 }
 0x17e   : > { %2976 = vmatprep.mubr.bf16.mxu1 %v3838_v26 }
 0x17f   : > { %v3969_v29 = vpop.f32.mrb[0].mxu0 }
 0x180   : > { %v4045_v32 = vpop.f32.mrb[0].mxu1  ;;  %v3970_v33 = vpop.f32.mrb[1].mxu0 }
 0x181   : > { %v3971_v35 = vadd.f32 %v3970_v33, %v3969_v29  ;;  %v4046_v36 = vpop.f32.mrb[1].mxu1  ;;  %v3972_v37 = vpop.f32.mrb[2].mxu0 }
 0x182   : > { %v4047_v40 = vadd.f32 %v4046_v36, %v4045_v32  ;;  %v4048_v41 = vpop.f32.mrb[2].mxu1  ;;  %v3973_v42 = vpop.f32.mrb[3].mxu0 }
 0x183   : > { %v3974_v44 = vadd.f32 %v3973_v42, %v3972_v37  ;;  %v4049_v45 = vpop.f32.mrb[3].mxu1 }
 0x184   : > { %v5398_v46 = vadd.f32 %v4047_v40, %v3971_v35  ;;  %v4050_v47 = vadd.f32 %v4049_v45, %v4048_v41  ;;  %2865 = vmatmul.mubr.bf16.gmra.mrb[108].mxu0 %v3835_v34  ;;  %v3783_v34 = vcombine.low %v1802_v5, %v1806_v6 }
 0x185   : > { %2977 = vmatmul.mubr.bf16.gmra.mrb[108].mxu1 %v3837_v38  ;;  %2872 = vmatprep.mubr.bf16.mxu0 %v3844_v39  ;;  %v3785_v38 = vcombine.low %v1803_v8, %v1807_v9  ;;  %v3792_v39 = vcombine.high %v1810_v27, %v1814_v28 }
 0x186   : > { %v5400_v48 = vadd.f32 %v4050_v47, %v3974_v44  ;;  %2984 = vmatprep.mubr.bf16.mxu1 %v3846_v43  ;;  %v3794_v43 = vcombine.high %v1811_v30, %v1815_v31 }
 0x187   : > { %v3975_v50 = vpop.f32.mrb[4].mxu0 }
 0x188   : > { %v4051_v52 = vpop.f32.mrb[4].mxu1  ;;  %v3976_v53 = vpop.f32.mrb[5].mxu0 }
 0x189   : > { %v3977_v55 = vadd.f32 %v3976_v53, %v3975_v50  ;;  %v4052_v56 = vpop.f32.mrb[5].mxu1  ;;  %v3978_v57 = vpop.f32.mrb[6].mxu0 }
 0x18a   : > { %v4053_v60 = vadd.f32 %v4052_v56, %v4051_v52  ;;  %v4054_v61 = vpop.f32.mrb[6].mxu1  ;;  %v3979_v62 = vpop.f32.mrb[7].mxu0  ;;  %v1822_v52 = vld [vmem:[%s5272_s17 + $0xb0] sm:$0xff] }
 0x18b   : > { %v3980_v0 = vadd.f32 %v3979_v62, %v3978_v57  ;;  %v4055_v1 = vpop.f32.mrb[7].mxu1  ;;  %v3793_v62 = vcombine.low %v1811_v30, %v1815_v31 }
 0x18c   : > { %v5404_v2 = vadd.f32 %v4053_v60, %v3977_v55  ;;  %v4056_v3 = vadd.f32 %v4055_v1, %v4054_v61  ;;  %2873 = vmatmul.mubr.bf16.gmra.mrb[112].mxu0 %v3843_v54  ;;  %v1819_v54 = vld [vmem:[%s5272_s17 + $0x98] sm:$0xff] }
 0x18d   : > { %2985 = vmatmul.mubr.bf16.gmra.mrb[112].mxu1 %v3845_v58  ;;  %2880 = vmatprep.mubr.bf16.mxu0 %v3852_v59  ;;  %v1823_v55 = vld [vmem:[%s5272_s17 + $0xb8] sm:$0xff]  ;;  %v3791_v58 = vcombine.low %v1810_v27, %v1814_v28 }
 0x18e   : > { %v5406_v4 = vadd.f32 %v4056_v3, %v3980_v0  ;;  %2992 = vmatprep.mubr.bf16.mxu1 %v3854_v63  ;;  %v3800_v63 = vcombine.high %v1818_v51, %v1822_v52  ;;  %v3802_v5 = vcombine.high %v1819_v54, %v1823_v55 }
 0x18f   : > { %v3981_v7 = vpop.f32.mrb[8].mxu0 }
 0x190   : > { %v4057_v10 = vpop.f32.mrb[8].mxu1  ;;  %v3982_v11 = vpop.f32.mrb[9].mxu0 }
 0x191   : > { %v3983_v13 = vadd.f32 %v3982_v11, %v3981_v7  ;;  %v4058_v14 = vpop.f32.mrb[9].mxu1  ;;  %v3984_v15 = vpop.f32.mrb[10].mxu0  ;;  %v1826_v11 = vld [vmem:[%s5272_s17 + $0xd0] sm:$0xff] }
 0x192   : > { %v4059_v18 = vadd.f32 %v4058_v14, %v4057_v10  ;;  %v4060_v19 = vpop.f32.mrb[10].mxu1  ;;  %v3985_v20 = vpop.f32.mrb[11].mxu0  ;;  %v1827_v14 = vld [vmem:[%s5272_s17 + $0xd8] sm:$0xff] }
 0x193   : > { %v3986_v22 = vadd.f32 %v3985_v20, %v3984_v15  ;;  %v4061_v23 = vpop.f32.mrb[11].mxu1  ;;  %v1831_v15 = vld [vmem:[%s5272_s17 + $0xf8] sm:$0xff] }
 0x194   : > { %v5412_v24 = vadd.f32 %v4059_v18, %v3983_v13  ;;  %v4062_v25 = vadd.f32 %v4061_v23, %v4060_v19  ;;  %2881 = vmatmul.mubr.bf16.gmra.mrb[116].mxu0 %v3851_v12  ;;  %v1830_v12 = vld [vmem:[%s5272_s17 + $0xf0] sm:$0xff]  ;;  %v3799_v18 = vcombine.low %v1818_v51, %v1822_v52 }
 0x195   : > { %2993 = vmatmul.mubr.bf16.gmra.mrb[116].mxu1 %v3853_v16  ;;  %3032 = vmatprep.mubr.bf16.mxu0 %v3784_v17  ;;  %v3808_v23 = vcombine.high %v1826_v11, %v1830_v12 }
 0x196   : > { %v5414_v26 = vadd.f32 %v4062_v25, %v3986_v22  ;;  %3144 = vmatprep.mubr.bf16.mxu1 %v3786_v21  ;;  %v3801_v22 = vcombine.low %v1819_v54, %v1823_v55 }
 0x197   : > { %v3987_v29 = vpop.f32.mrb[12].mxu0 }
 0x198   : > { %v4063_v32 = vpop.f32.mrb[12].mxu1  ;;  %v3988_v33 = vpop.f32.mrb[13].mxu0 }
 0x199   : > { %v3989_v35 = vadd.f32 %v3988_v33, %v3987_v29  ;;  %v4064_v36 = vpop.f32.mrb[13].mxu1  ;;  %v3990_v37 = vpop.f32.mrb[14].mxu0  ;;  %v3810_v29 = vcombine.high %v1827_v14, %v1831_v15 }
 0x19a   : > { %v4065_v40 = vadd.f32 %v4064_v36, %v4063_v32  ;;  %v4066_v41 = vpop.f32.mrb[14].mxu1  ;;  %v3991_v42 = vpop.f32.mrb[15].mxu0  ;;  %v1838_v36 = vld [vmem:[%s5272_s17 + $0x130] sm:$0xff] }
 0x19b   : > { %v3992_v44 = vadd.f32 %v3991_v42, %v3990_v37  ;;  %v4067_v45 = vpop.f32.mrb[15].mxu1  ;;  %v3807_v42 = vcombine.low %v1826_v11, %v1830_v12 }
 0x19c   : > { %v5420_v47 = vadd.f32 %v4065_v40, %v3989_v35  ;;  %v4068_v49 = vadd.f32 %v4067_v45, %v4066_v41  ;;  %3033 = vmatmul.mubr.bf16.vlgmr.msra.gmra.mrb[120].mxu0 %v3783_v34  ;;  %v1834_v35 = vld [vmem:[%s5272_s17 + $0x110] sm:$0xff] }
 0x19d   : > { %3145 = vmatmul.mubr.bf16.vlgmr.msra.gmra.mrb[120].mxu1 %v3785_v38  ;;  %3040 = vmatprep.mubr.bf16.mxu0 %v3792_v39  ;;  %v1835_v38 = vld [vmem:[%s5272_s17 + $0x118] sm:$0xff]  ;;  %v3816_v51 = vcombine.high %v1834_v35, %v1838_v36 }
 0x19e   : > { %v5422_v50 = vadd.f32 %v4068_v49, %v3992_v44  ;;  %3152 = vmatprep.mubr.bf16.mxu1 %v3794_v43  ;;  %v1839_v39 = vld [vmem:[%s5272_s17 + $0x138] sm:$0xff]  ;;  %v3809_v49 = vcombine.low %v1827_v14, %v1831_v15 }
 0x19f   : > { %v3993_v53 = vpop.f32.mrb[16].mxu0  ;;  %v3818_v55 = vcombine.high %v1835_v38, %v1839_v39  ;;  %v3817_v12 = vcombine.low %v1835_v38, %v1839_v39 }
 0x1a0   : > { %v4069_v56 = vpop.f32.mrb[16].mxu1  ;;  %v3994_v57 = vpop.f32.mrb[17].mxu0 }
 0x1a1   : > { %v3995_v59 = vadd.f32 %v3994_v57, %v3993_v53  ;;  %v4070_v60 = vpop.f32.mrb[17].mxu1  ;;  %v3996_v61 = vpop.f32.mrb[18].mxu0 }
 0x1a2   : > { %v4071_v0 = vadd.f32 %v4070_v60, %v4069_v56  ;;  %v4072_v1 = vpop.f32.mrb[18].mxu1  ;;  %v3997_v3 = vpop.f32.mrb[19].mxu0 }
 0x1a3   : > { %v3998_v6 = vadd.f32 %v3997_v3, %v3996_v61  ;;  %v4073_v7 = vpop.f32.mrb[19].mxu1  ;;  %v1842_v61 = vld [vmem:[%s5272_s17 + $0x150] sm:$0xff] }
 0x1a4   : > { %v5428_v8 = vadd.f32 %v4071_v0, %v3995_v59  ;;  %v4074_v9 = vadd.f32 %v4073_v7, %v4072_v1  ;;  %3041 = vmatmul.mubr.bf16.gmra.mrb[124].mxu0 %v3791_v58  ;;  %v1843_v0 = vld [vmem:[%s5272_s17 + $0x158] sm:$0xff] }
 0x1a5   : > { %3153 = vmatmul.mubr.bf16.gmra.mrb[124].mxu1 %v3793_v62  ;;  %3048 = vmatprep.mubr.bf16.mxu0 %v3800_v63  ;;  %v1846_v62 = vld [vmem:[%s5272_s17 + $0x170] sm:$0xff]  ;;  %v1847_v1 = vld [vmem:[%s5272_s17 + $0x178] sm:$0xff] }
 0x1a6   : > { %v5430_v10 = vadd.f32 %v4074_v9, %v3998_v6  ;;  %3160 = vmatprep.mubr.bf16.mxu1 %v3802_v5  ;;  %v3815_v6 = vcombine.low %v1834_v35, %v1838_v36  ;;  %v3825_v38 = vcombine.low %v1843_v0, %v1847_v1 }
 0x1a7   : > { %v3999_v13 = vpop.f32.mrb[20].mxu0 }
 0x1a8   : > { %v4075_v16 = vpop.f32.mrb[20].mxu1  ;;  %v4000_v17 = vpop.f32.mrb[21].mxu0 }
 0x1a9   : > { %v4001_v19 = vadd.f32 %v4000_v17, %v3999_v13  ;;  %v4076_v20 = vpop.f32.mrb[21].mxu1  ;;  %v4002_v21 = vpop.f32.mrb[22].mxu0  ;;  %v3824_v13 = vcombine.high %v1842_v61, %v1846_v62  ;;  %v3826_v17 = vcombine.high %v1843_v0, %v1847_v1 }
 0x1aa   : > { %v4077_v25 = vadd.f32 %v4076_v20, %v4075_v16  ;;  %v4078_v27 = vpop.f32.mrb[22].mxu1  ;;  %v4003_v28 = vpop.f32.mrb[23].mxu0 }
 0x1ab   : > { %v4004_v30 = vadd.f32 %v4003_v28, %v4002_v21  ;;  %v4079_v31 = vpop.f32.mrb[23].mxu1  ;;  %v1851_v28 = vld [vmem:[%s5272_s17 + $0x198] sm:$0xff] }
 0x1ac   : > { %v5436_v32 = vadd.f32 %v4077_v25, %v4001_v19  ;;  %v4080_v33 = vadd.f32 %v4079_v31, %v4078_v27  ;;  %3049 = vmatmul.mubr.bf16.gmra.mrb[128].mxu0 %v3799_v18  ;;  %v1854_v25 = vld [vmem:[%s5272_s17 + $0x1b0] sm:$0xff] }
 0x1ad   : > { %3161 = vmatmul.mubr.bf16.gmra.mrb[128].mxu1 %v3801_v22  ;;  %3056 = vmatprep.mubr.bf16.mxu0 %v3808_v23  ;;  %v1850_v23 = vld [vmem:[%s5272_s17 + $0x190] sm:$0xff] }
 0x1ae   : > { %v5438_v34 = vadd.f32 %v4080_v33, %v4004_v30  ;;  %3168 = vmatprep.mubr.bf16.mxu1 %v3810_v29  ;;  %v1855_v29 = vld [vmem:[%s5272_s17 + $0x1b8] sm:$0xff]  ;;  %v3823_v33 = vcombine.low %v1842_v61, %v1846_v62  ;;  %v3832_v39 = vcombine.high %v1850_v23, %v1854_v25  ;;  %v3831_v62 = vcombine.low %v1850_v23, %v1854_v25 }
 0x1af   : > { %v4005_v37 = vpop.f32.mrb[24].mxu0 }
 0x1b0   : > { %v4081_v40 = vpop.f32.mrb[24].mxu1  ;;  %v4006_v41 = vpop.f32.mrb[25].mxu0 }
 0x1b1   : > { %v4007_v43 = vadd.f32 %v4006_v41, %v4005_v37  ;;  %v4082_v44 = vpop.f32.mrb[25].mxu1  ;;  %v4008_v45 = vpop.f32.mrb[26].mxu0 }
 0x1b2   : > { %v4083_v52 = vadd.f32 %v4082_v44, %v4081_v40  ;;  %v4084_v53 = vpop.f32.mrb[26].mxu1  ;;  %v4009_v54 = vpop.f32.mrb[27].mxu0 }
 0x1b3   : > { %v4010_v56 = vadd.f32 %v4009_v54, %v4008_v45  ;;  %v4085_v57 = vpop.f32.mrb[27].mxu1  ;;  %v1862_v54 = vld [vmem:[%s5272_s17 + $0x1f0] sm:$0xff] }
 0x1b4   : > { %v5444_v58 = vadd.f32 %v4083_v52, %v4007_v43  ;;  %v4086_v59 = vadd.f32 %v4085_v57, %v4084_v53  ;;  %3057 = vmatmul.mubr.bf16.gmra.mrb[132].mxu0 %v3807_v42  ;;  %v3834_v43 = vcombine.high %v1851_v28, %v1855_v29  ;;  %v1858_v53 = vld [vmem:[%s5272_s17 + $0x1d0] sm:$0xff]  ;;  %v1863_v57 = vld [vmem:[%s5272_s17 + $0x1f8] sm:$0xff] }
 0x1b5   : > { %3169 = vmatmul.mubr.bf16.gmra.mrb[132].mxu1 %v3809_v49  ;;  %3064 = vmatprep.mubr.bf16.mxu0 %v3816_v51  ;;  %v3839_v23 = vcombine.low %v1858_v53, %v1862_v54 }
 0x1b6   : > { %v5446_v60 = vadd.f32 %v4086_v59, %v4010_v56  ;;  %3176 = vmatprep.mubr.bf16.mxu1 %v3818_v55  ;;  %v1859_v56 = vld [vmem:[%s5272_s17 + $0x1d8] sm:$0xff] }
 0x1b7   : > { %v4011_v63 = vpop.f32.mrb[28].mxu0 }
 0x1b8   : > { %v4087_v3 = vpop.f32.mrb[28].mxu1  ;;  %v4012_v5 = vpop.f32.mrb[29].mxu0 }
 0x1b9   : > { %v4013_v7 = vadd.f32 %v4012_v5, %v4011_v63  ;;  %v4088_v9 = vpop.f32.mrb[29].mxu1  ;;  %v4014_v11 = vpop.f32.mrb[30].mxu0  ;;  %v3840_v5 = vcombine.high %v1858_v53, %v1862_v54 }
 0x1ba   : > { %v4089_v14 = vadd.f32 %v4088_v9, %v4087_v3  ;;  %v4090_v15 = vpop.f32.mrb[30].mxu1  ;;  %v4015_v16 = vpop.f32.mrb[31].mxu0  ;;  %v3833_v3 = vcombine.low %v1851_v28, %v1855_v29  ;;  %v3841_v29 = vcombine.low %v1859_v56, %v1863_v57 }
 0x1bb   : > { %v4016_v18 = vadd.f32 %v4015_v16, %v4014_v11  ;;  %v4091_v19 = vpop.f32.mrb[31].mxu1  ;;  %v3842_v11 = vcombine.high %v1859_v56, %v1863_v57 }
 0x1bc   : > { %v5452_v20 = vadd.f32 %v4089_v14, %v4013_v7  ;;  %v4092_v21 = vadd.f32 %v4091_v19, %v4090_v15  ;;  %3065 = vmatmul.mubr.bf16.gmra.mrb[136].mxu0 %v3815_v6  ;;  %v1866_v14 = vld [vmem:[%s5272_s17 + $0x210] sm:$0xff] }
 0x1bd   : > { %3177 = vmatmul.mubr.bf16.gmra.mrb[136].mxu1 %v3817_v12  ;;  %3072 = vmatprep.mubr.bf16.mxu0 %v3824_v13  ;;  %v1870_v15 = vld [vmem:[%s5272_s17 + $0x230] sm:$0xff] }
 0x1be   : > { %v5454_v22 = vadd.f32 %v4092_v21, %v4016_v18  ;;  %3184 = vmatprep.mubr.bf16.mxu1 %v3826_v17  ;;  %v1867_v17 = vld [vmem:[%s5272_s17 + $0x218] sm:$0xff] }
 0x1bf   : > { %v4017_v27 = vpop.f32.mrb[32].mxu0  ;;  %v1871_v18 = vld [vmem:[%s5272_s17 + $0x238] sm:$0xff] }
 0x1c0   : > { %v4093_v30 = vpop.f32.mrb[32].mxu1  ;;  %v4018_v31 = vpop.f32.mrb[33].mxu0 }
 0x1c1   : > { %v4019_v35 = vadd.f32 %v4018_v31, %v4017_v27  ;;  %v4094_v36 = vpop.f32.mrb[33].mxu1  ;;  %v4020_v37 = vpop.f32.mrb[34].mxu0 }
 0x1c2   : > { %v4095_v40 = vadd.f32 %v4094_v36, %v4093_v30  ;;  %v4096_v41 = vpop.f32.mrb[34].mxu1  ;;  %v4021_v42 = vpop.f32.mrb[35].mxu0  ;;  %v3848_v30 = vcombine.high %v1866_v14, %v1870_v15  ;;  %v3850_v36 = vcombine.high %v1867_v17, %v1871_v18 }
 0x1c3   : > { %v4022_v44 = vadd.f32 %v4021_v42, %v4020_v37  ;;  %v4097_v45 = vpop.f32.mrb[35].mxu1 }
 0x1c4   : > { %v5460_v49 = vadd.f32 %v4095_v40, %v4019_v35  ;;  %v4098_v51 = vadd.f32 %v4097_v45, %v4096_v41  ;;  %3073 = vmatmul.mubr.bf16.gmra.mrb[140].mxu0 %v3823_v33 }
 0x1c5   : > { %3185 = vmatmul.mubr.bf16.gmra.mrb[140].mxu1 %v3825_v38  ;;  %3080 = vmatprep.mubr.bf16.mxu0 %v3832_v39 }
 0x1c6   : > { %v5462_v52 = vadd.f32 %v4098_v51, %v4022_v44  ;;  %3192 = vmatprep.mubr.bf16.mxu1 %v3834_v43  ;;  %v1874_v43 = vld [vmem:[%s5272_s17 + $0x250] sm:$0xff]  ;;  %v1875_v51 = vld [vmem:[%s5272_s17 + $0x258] sm:$0xff] }
 0x1c7   : > { %v4023_v55 = vpop.f32.mrb[36].mxu0 }
 0x1c8   : > { %v4099_v59 = vpop.f32.mrb[36].mxu1  ;;  %v4024_v61 = vpop.f32.mrb[37].mxu0 }
 0x1c9   : > { %v4025_v63 = vadd.f32 %v4024_v61, %v4023_v55  ;;  %v4100_v0 = vpop.f32.mrb[37].mxu1  ;;  %v4026_v1 = vpop.f32.mrb[38].mxu0  ;;  %v3847_v55 = vcombine.low %v1866_v14, %v1870_v15  ;;  %v3856_v61 = vcombine.high %v1874_v43, %v1874_v43 }
 0x1ca   : > { %v4101_v6 = vadd.f32 %v4100_v0, %v4099_v59  ;;  %v4102_v7 = vpop.f32.mrb[38].mxu1  ;;  %v4027_v9 = vpop.f32.mrb[39].mxu0  ;;  %v3849_v59 = vcombine.low %v1867_v17, %v1871_v18 }
 0x1cb   : > { %v4103_v12 = vpop.f32.mrb[39].mxu1 }
 0x1cc   : > { %v5468_v13 = vadd.f32 %v4101_v6, %v4025_v63  ;;  %3081 = vmatmul.mubr.bf16.gmra.mrb[144].mxu0 %v3831_v62 }
 0x1cd   : > { %3193 = vmatmul.mubr.bf16.gmra.mrb[144].mxu1 %v3833_v3  ;;  %3088 = vmatprep.mubr.bf16.mxu0 %v3840_v5 }
 0x1ce   : > { %3200 = vmatprep.mubr.bf16.mxu1 %v3842_v11 }
 0x1cf   : > { %v4121_v16 = vpop.f32.mrb[40].mxu0 }
 0x1d0   : > { %v4197_v19 = vpop.f32.mrb[40].mxu1  ;;  %v4122_v21 = vpop.f32.mrb[41].mxu0 }
 0x1d1   : > { %v4123_v25 = vadd.f32 %v4122_v21, %v4121_v16  ;;  %v4198_v27 = vpop.f32.mrb[41].mxu1  ;;  %v4124_v28 = vpop.f32.mrb[42].mxu0  ;;  %v3855_v16 = vcombine.low %v1874_v43, %v1874_v43 }
 0x1d2   : > { %v4199_v31 = vadd.f32 %v4198_v27, %v4197_v19  ;;  %v4200_v33 = vpop.f32.mrb[42].mxu1  ;;  %v4125_v35 = vpop.f32.mrb[43].mxu0  ;;  %v3857_v19 = vcombine.low %v1875_v51, %v1875_v51 }
 0x1d3   : > { %v1611_v37 = vadd.f32 %v4123_v25, %v5398_v46  ;;  %v4126_v38 = vadd.f32 %v4125_v35, %v4124_v28  ;;  %v4201_v39 = vpop.f32.mrb[43].mxu1 }
 0x1d4   : > { %v4202_v40 = vadd.f32 %v4201_v39, %v4200_v33  ;;  %3089 = vmatmul.mubr.bf16.gmra.mrb[148].mxu0 %v3839_v23 }
 0x1d5   : > { %v5475_v41 = vadd.f32 %v4199_v31, %v1611_v37  ;;  %v1614_v42 = vadd.f32 %v4126_v38, %v5400_v48  ;;  %3201 = vmatmul.mubr.bf16.gmra.mrb[148].mxu1 %v3841_v29  ;;  %3096 = vmatprep.mubr.bf16.mxu0 %v3848_v30  ;;  %v3858_v48 = vcombine.high %v1875_v51, %v1875_v51 }
 0x1d6   : > { %3208 = vmatprep.mubr.bf16.mxu1 %v3850_v36 }
 0x1d7   : > { %v5479_v44 = vadd.f32 %v4202_v40, %v1614_v42  ;;  %v4127_v45 = vpop.f32.mrb[44].mxu0 }
 0x1d8   : > { %v4203_v53 = vpop.f32.mrb[44].mxu1  ;;  %v4128_v54 = vpop.f32.mrb[45].mxu0 }
 0x1d9   : > { %v4129_v46 = vadd.f32 %v4128_v54, %v4127_v45  ;;  %v4204_v56 = vpop.f32.mrb[45].mxu1  ;;  %v4130_v57 = vpop.f32.mrb[46].mxu0 }
 0x1da   : > { %v4205_v62 = vadd.f32 %v4204_v56, %v4203_v53  ;;  %v4206_v63 = vpop.f32.mrb[46].mxu1  ;;  %v4131_v0 = vpop.f32.mrb[47].mxu0 }
 0x1db   : > { %v1619_v1 = vadd.f32 %v4129_v46, %v5404_v2  ;;  %v4132_v3 = vadd.f32 %v4131_v0, %v4130_v57  ;;  %v4207_v5 = vpop.f32.mrb[47].mxu1 }
 0x1dc   : > { %v4208_v6 = vadd.f32 %v4207_v5, %v4206_v63  ;;  %3097 = vmatmul.mubr.bf16.gmra.mrb[152].mxu0 %v3847_v55 }
 0x1dd   : > { %v5483_v7 = vadd.f32 %v4205_v62, %v1619_v1  ;;  %v1622_v9 = vadd.f32 %v4132_v3, %v5406_v4  ;;  %3209 = vmatmul.mubr.bf16.gmra.mrb[152].mxu1 %v3849_v59  ;;  %3104 = vmatprep.mubr.bf16.mxu0 %v3856_v61 }
 0x1de   : > { %3216 = vmatprep.mubr.bf16.mxu1 %v3858_v48 }
 0x1df   : > { %v5486_v11 = vadd.f32 %v4208_v6, %v1622_v9  ;;  %v4133_v12 = vpop.f32.mrb[48].mxu0 }
 0x1e0   : > { %v4209_v14 = vpop.f32.mrb[48].mxu1  ;;  %v4134_v15 = vpop.f32.mrb[49].mxu0 }
 0x1e1   : > { %v4135_v17 = vadd.f32 %v4134_v15, %v4133_v12  ;;  %v4210_v18 = vpop.f32.mrb[49].mxu1  ;;  %v4136_v2 = vpop.f32.mrb[50].mxu0 }
 0x1e2   : > { %v4211_v21 = vadd.f32 %v4210_v18, %v4209_v14  ;;  %v4212_v23 = vpop.f32.mrb[50].mxu1  ;;  %v4137_v25 = vpop.f32.mrb[51].mxu0 }
 0x1e3   : > { %v1627_v27 = vadd.f32 %v4135_v17, %v5412_v24  ;;  %v4138_v28 = vadd.f32 %v4137_v25, %v4136_v2  ;;  %v4213_v4 = vpop.f32.mrb[51].mxu1 }
 0x1e4   : > { %v4214_v29 = vadd.f32 %v4213_v4, %v4212_v23  ;;  %3105 = vmatmul.mubr.bf16.gmra.mrb[156].mxu0 %v3855_v16 }
 0x1e5   : > { %v5489_v30 = vadd.f32 %v4211_v21, %v1627_v27  ;;  %v1630_v31 = vadd.f32 %v4138_v28, %v5414_v26  ;;  %3217 = vmatmul.mubr.bf16.gmra.mrb[156].mxu1 %v3857_v19 }
 0x1e7   : > { %v5492_v33 = vadd.f32 %v4214_v29, %v1630_v31  ;;  %v4139_v35 = vpop.f32.mrb[52].mxu0 }
 0x1e8   : > { %v4215_v36 = vpop.f32.mrb[52].mxu1  ;;  %v4140_v37 = vpop.f32.mrb[53].mxu0 }
 0x1e9   : > { %v4141_v38 = vadd.f32 %v4140_v37, %v4139_v35  ;;  %v4216_v39 = vpop.f32.mrb[53].mxu1  ;;  %v4142_v40 = vpop.f32.mrb[54].mxu0 }
 0x1ea   : > { %v4217_v42 = vadd.f32 %v4216_v39, %v4215_v36  ;;  %v4218_v43 = vpop.f32.mrb[54].mxu1  ;;  %v4143_v24 = vpop.f32.mrb[55].mxu0 }
 0x1eb   : > { %v1635_v45 = vadd.f32 %v4141_v38, %v5420_v47  ;;  %v4144_v51 = vadd.f32 %v4143_v24, %v4142_v40  ;;  %v4219_v53 = vpop.f32.mrb[55].mxu1 }
 0x1ec   : > { %v4220_v54 = vadd.f32 %v4219_v53, %v4218_v43 }
 0x1ed   : > { %v5495_v55 = vadd.f32 %v4217_v42, %v1635_v45  ;;  %v1638_v26 = vadd.f32 %v4144_v51, %v5422_v50 }
 0x1ef   : > { %v5498_v46 = vadd.f32 %v4220_v54, %v1638_v26  ;;  %v4145_v56 = vpop.f32.mrb[56].mxu0 }
 0x1f0   : > { %v4221_v57 = vpop.f32.mrb[56].mxu1  ;;  %v4146_v59 = vpop.f32.mrb[57].mxu0 }
 0x1f1   : > { %v4147_v61 = vadd.f32 %v4146_v59, %v4145_v56  ;;  %v4222_v62 = vpop.f32.mrb[57].mxu1  ;;  %v4148_v63 = vpop.f32.mrb[58].mxu0 }
 0x1f2   : > { %v4223_v0 = vadd.f32 %v4222_v62, %v4221_v57  ;;  %v4224_v48 = vpop.f32.mrb[58].mxu1  ;;  %v4149_v1 = vpop.f32.mrb[59].mxu0 }
 0x1f3   : > { %v1643_v47 = vadd.f32 %v4147_v61, %v5428_v8  ;;  %v4150_v3 = vadd.f32 %v4149_v1, %v4148_v63  ;;  %v4225_v5 = vpop.f32.mrb[59].mxu1 }
 0x1f4   : > { %v4226_v6 = vadd.f32 %v4225_v5, %v4224_v48 }
 0x1f5   : > { %v5501_v9 = vadd.f32 %v4223_v0, %v1643_v47  ;;  %v1646_v50 = vadd.f32 %v4150_v3, %v5430_v10 }
 0x1f7   : > { %v5504_v12 = vadd.f32 %v4226_v6, %v1646_v50  ;;  %v4151_v14 = vpop.f32.mrb[60].mxu0 }
 0x1f8   : > { %v4227_v15 = vpop.f32.mrb[60].mxu1  ;;  %v4152_v16 = vpop.f32.mrb[61].mxu0 }
 0x1f9   : > { %v4153_v17 = vadd.f32 %v4152_v16, %v4151_v14  ;;  %v4228_v18 = vpop.f32.mrb[61].mxu1  ;;  %v4154_v2 = vpop.f32.mrb[62].mxu0 }
 0x1fa   : > { %v4229_v19 = vadd.f32 %v4228_v18, %v4227_v15  ;;  %v4230_v21 = vpop.f32.mrb[62].mxu1  ;;  %v4155_v23 = vpop.f32.mrb[63].mxu0 }
 0x1fb   : > { %v1651_v8 = vadd.f32 %v4153_v17, %v5436_v32  ;;  %v4156_v25 = vadd.f32 %v4155_v23, %v4154_v2  ;;  %v4231_v27 = vpop.f32.mrb[63].mxu1 }
 0x1fc   : > { %v4232_v28 = vadd.f32 %v4231_v27, %v4230_v21 }
 0x1fd   : > { %v5507_v4 = vadd.f32 %v4229_v19, %v1651_v8  ;;  %v1654_v10 = vadd.f32 %v4156_v25, %v5438_v34 }
 0x1ff   : > { %v5510_v29 = vadd.f32 %v4232_v28, %v1654_v10  ;;  %v4157_v31 = vpop.f32.mrb[64].mxu0 }
 0x200   : > { %v4233_v35 = vpop.f32.mrb[64].mxu1  ;;  %v4158_v36 = vpop.f32.mrb[65].mxu0 }
 0x201   : > { %v4159_v37 = vadd.f32 %v4158_v36, %v4157_v31  ;;  %v4234_v38 = vpop.f32.mrb[65].mxu1  ;;  %v4160_v39 = vpop.f32.mrb[66].mxu0 }
 0x202   : > { %v4235_v40 = vadd.f32 %v4234_v38, %v4233_v35  ;;  %v4236_v42 = vpop.f32.mrb[66].mxu1  ;;  %v4161_v43 = vpop.f32.mrb[67].mxu0 }
 0x203   : > { %v1659_v32 = vadd.f32 %v4159_v37, %v5444_v58  ;;  %v4162_v24 = vadd.f32 %v4161_v43, %v4160_v39  ;;  %v4237_v45 = vpop.f32.mrb[67].mxu1 }
 0x204   : > { %v4238_v51 = vadd.f32 %v4237_v45, %v4236_v42 }
 0x205   : > { %v5513_v53 = vadd.f32 %v4235_v40, %v1659_v32  ;;  %v1662_v34 = vadd.f32 %v4162_v24, %v5446_v60 }
 0x207   : > { %v5516_v54 = vadd.f32 %v4238_v51, %v1662_v34  ;;  %v4163_v26 = vpop.f32.mrb[68].mxu0 }
 0x208   : > { %v4239_v56 = vpop.f32.mrb[68].mxu1  ;;  %v4164_v57 = vpop.f32.mrb[69].mxu0 }
 0x209   : > { %v4165_v59 = vadd.f32 %v4164_v57, %v4163_v26  ;;  %v4240_v61 = vpop.f32.mrb[69].mxu1  ;;  %v4166_v62 = vpop.f32.mrb[70].mxu0 }
 0x20a   : > { %v4241_v63 = vadd.f32 %v4240_v61, %v4239_v56  ;;  %v4242_v0 = vpop.f32.mrb[70].mxu1  ;;  %v4167_v48 = vpop.f32.mrb[71].mxu0 }
 0x20b   : > { %v1667_v58 = vadd.f32 %v4165_v59, %v5452_v20  ;;  %v4168_v1 = vadd.f32 %v4167_v48, %v4166_v62  ;;  %v4243_v47 = vpop.f32.mrb[71].mxu1 }
 0x20c   : > { %v4244_v3 = vadd.f32 %v4243_v47, %v4242_v0 }
 0x20d   : > { %v5519_v5 = vadd.f32 %v4241_v63, %v1667_v58  ;;  %v1670_v60 = vadd.f32 %v4168_v1, %v5454_v22 }
 0x20f   : > { %v5522_v6 = vadd.f32 %v4244_v3, %v1670_v60  ;;  %v4169_v50 = vpop.f32.mrb[72].mxu0 }
 0x210   : > { %v4245_v14 = vpop.f32.mrb[72].mxu1  ;;  %v4170_v15 = vpop.f32.mrb[73].mxu0 }
 0x211   : > { %v4171_v16 = vadd.f32 %v4170_v15, %v4169_v50  ;;  %v4246_v17 = vpop.f32.mrb[73].mxu1  ;;  %v4172_v18 = vpop.f32.mrb[74].mxu0 }
 0x212   : > { %v4247_v2 = vadd.f32 %v4246_v17, %v4245_v14  ;;  %v4248_v19 = vpop.f32.mrb[74].mxu1  ;;  %v4173_v21 = vpop.f32.mrb[75].mxu0 }
 0x213   : > { %v1675_v20 = vadd.f32 %v4171_v16, %v5460_v49  ;;  %v4174_v23 = vadd.f32 %v4173_v21, %v4172_v18  ;;  %v4249_v8 = vpop.f32.mrb[75].mxu1 }
 0x214   : > { %v4250_v25 = vadd.f32 %v4249_v8, %v4248_v19 }
 0x215   : > { %v5525_v27 = vadd.f32 %v4247_v2, %v1675_v20  ;;  %v1678_v22 = vadd.f32 %v4174_v23, %v5462_v52 }
 0x217   : > { %v5528_v28 = vadd.f32 %v4250_v25, %v1678_v22  ;;  %v4175_v10 = vpop.f32.mrb[76].mxu0 }
 0x218   : > { %v4251_v31 = vpop.f32.mrb[76].mxu1  ;;  %v4176_v35 = vpop.f32.mrb[77].mxu0 }
 0x219   : > { %v4177_v36 = vadd.f32 %v4176_v35, %v4175_v10  ;;  %v4252_v37 = vpop.f32.mrb[77].mxu1  ;;  %v4178_v38 = vpop.f32.mrb[78].mxu0 }
 0x21a   : > { %v4253_v39 = vadd.f32 %v4252_v37, %v4251_v31  ;;  %v4254_v40 = vpop.f32.mrb[78].mxu1  ;;  %v4179_v42 = vpop.f32.mrb[79].mxu0 }
 0x21b   : > { %v1683_v49 = vadd.f32 %v4177_v36, %v5468_v13  ;;  %v4255_v43 = vpop.f32.mrb[79].mxu1 }
 0x21d   : > { %v5531_v32 = vadd.f32 %v4253_v39, %v1683_v49 }
 0x21f   : > { %v4273_v24 = vpop.f32.mrb[80].mxu0 }
 0x220   : > { %v4349_v45 = vpop.f32.mrb[80].mxu1  ;;  %v4274_v51 = vpop.f32.mrb[81].mxu0 }
 0x221   : > { %v4275_v52 = vadd.f32 %v4274_v51, %v4273_v24  ;;  %v4350_v34 = vpop.f32.mrb[81].mxu1  ;;  %v4276_v26 = vpop.f32.mrb[82].mxu0 }
 0x222   : > { %v4351_v56 = vadd.f32 %v4350_v34, %v4349_v45  ;;  %v4352_v57 = vpop.f32.mrb[82].mxu1  ;;  %v4277_v59 = vpop.f32.mrb[83].mxu0 }
 0x223   : > { %v4278_v61 = vadd.f32 %v4277_v59, %v4276_v26  ;;  %v4353_v62 = vpop.f32.mrb[83].mxu1 }
 0x224   : > { %v5533_v63 = vadd.f32 %v4351_v56, %v4275_v52  ;;  %v4354_v0 = vadd.f32 %v4353_v62, %v4352_v57 }
 0x226   : > { %v5535_v48 = vadd.f32 %v4354_v0, %v4278_v61 }
 0x227   : > { %v4279_v13 = vpop.f32.mrb[84].mxu0 }
 0x228   : > { %v4355_v58 = vpop.f32.mrb[84].mxu1  ;;  %v4280_v1 = vpop.f32.mrb[85].mxu0 }
 0x229   : > { %v4281_v47 = vadd.f32 %v4280_v1, %v4279_v13  ;;  %v4356_v3 = vpop.f32.mrb[85].mxu1  ;;  %v4282_v60 = vpop.f32.mrb[86].mxu0 }
 0x22a   : > { %v4357_v50 = vadd.f32 %v4356_v3, %v4355_v58  ;;  %v4358_v14 = vpop.f32.mrb[86].mxu1  ;;  %v4283_v15 = vpop.f32.mrb[87].mxu0 }
 0x22b   : > { %v4284_v16 = vadd.f32 %v4283_v15, %v4282_v60  ;;  %v4359_v17 = vpop.f32.mrb[87].mxu1 }
 0x22c   : > { %v5537_v18 = vadd.f32 %v4357_v50, %v4281_v47  ;;  %v4360_v2 = vadd.f32 %v4359_v17, %v4358_v14 }
 0x22e   : > { %v5539_v19 = vadd.f32 %v4360_v2, %v4284_v16 }
 0x22f   : > { %v4285_v21 = vpop.f32.mrb[88].mxu0 }
 0x230   : > { %v4361_v20 = vpop.f32.mrb[88].mxu1  ;;  %v4286_v23 = vpop.f32.mrb[89].mxu0 }
 0x231   : > { %v4287_v8 = vadd.f32 %v4286_v23, %v4285_v21  ;;  %v4362_v25 = vpop.f32.mrb[89].mxu1  ;;  %v4288_v22 = vpop.f32.mrb[90].mxu0 }
 0x232   : > { %v4363_v10 = vadd.f32 %v4362_v25, %v4361_v20  ;;  %v4364_v31 = vpop.f32.mrb[90].mxu1  ;;  %v4289_v35 = vpop.f32.mrb[91].mxu0 }
 0x233   : > { %v4290_v36 = vadd.f32 %v4289_v35, %v4288_v22  ;;  %v4365_v37 = vpop.f32.mrb[91].mxu1 }
 0x234   : > { %v5541_v38 = vadd.f32 %v4363_v10, %v4287_v8  ;;  %v4366_v39 = vadd.f32 %v4365_v37, %v4364_v31 }
 0x236   : > { %v5543_v40 = vadd.f32 %v4366_v39, %v4290_v36 }
 0x237   : > { %v4291_v42 = vpop.f32.mrb[92].mxu0 }
 0x238   : > { %v4367_v49 = vpop.f32.mrb[92].mxu1  ;;  %v4292_v43 = vpop.f32.mrb[93].mxu0 }
 0x239   : > { %v4293_v24 = vadd.f32 %v4292_v43, %v4291_v42  ;;  %v4368_v45 = vpop.f32.mrb[93].mxu1  ;;  %v4294_v51 = vpop.f32.mrb[94].mxu0 }
 0x23a   : > { %v4369_v52 = vadd.f32 %v4368_v45, %v4367_v49  ;;  %v4370_v34 = vpop.f32.mrb[94].mxu1  ;;  %v4295_v26 = vpop.f32.mrb[95].mxu0 }
 0x23b   : > { %v4296_v56 = vadd.f32 %v4295_v26, %v4294_v51  ;;  %v4371_v57 = vpop.f32.mrb[95].mxu1 }
 0x23c   : > { %v5545_v59 = vadd.f32 %v4369_v52, %v4293_v24  ;;  %v4372_v61 = vadd.f32 %v4371_v57, %v4370_v34 }
 0x23e   : > { %v5547_v62 = vadd.f32 %v4372_v61, %v4296_v56 }
 0x23f   : > { %v4297_v0 = vpop.f32.mrb[96].mxu0 }
 0x240   : > { %v4373_v13 = vpop.f32.mrb[96].mxu1  ;;  %v4298_v58 = vpop.f32.mrb[97].mxu0 }
 0x241   : > { %v4299_v1 = vadd.f32 %v4298_v58, %v4297_v0  ;;  %v4374_v47 = vpop.f32.mrb[97].mxu1  ;;  %v4300_v3 = vpop.f32.mrb[98].mxu0 }
 0x242   : > { %v4375_v60 = vadd.f32 %v4374_v47, %v4373_v13  ;;  %v4376_v50 = vpop.f32.mrb[98].mxu1  ;;  %v4301_v14 = vpop.f32.mrb[99].mxu0 }
 0x243   : > { %v4302_v15 = vadd.f32 %v4301_v14, %v4300_v3  ;;  %v4377_v16 = vpop.f32.mrb[99].mxu1 }
 0x244   : > { %v5549_v17 = vadd.f32 %v4375_v60, %v4299_v1  ;;  %v4378_v2 = vadd.f32 %v4377_v16, %v4376_v50 }
 0x246   : > { %v5551_v21 = vadd.f32 %v4378_v2, %v4302_v15 }
 0x247   : > { %v4303_v20 = vpop.f32.mrb[100].mxu0 }
 0x248   : > { %v4379_v23 = vpop.f32.mrb[100].mxu1  ;;  %v4304_v8 = vpop.f32.mrb[101].mxu0 }
 0x249   : > { %v4305_v25 = vadd.f32 %v4304_v8, %v4303_v20  ;;  %v4380_v22 = vpop.f32.mrb[101].mxu1  ;;  %v4306_v10 = vpop.f32.mrb[102].mxu0 }
 0x24a   : > { %v4381_v31 = vadd.f32 %v4380_v22, %v4379_v23  ;;  %v4382_v35 = vpop.f32.mrb[102].mxu1  ;;  %v4307_v36 = vpop.f32.mrb[103].mxu0 }
 0x24b   : > { %v4308_v37 = vadd.f32 %v4307_v36, %v4306_v10  ;;  %v4383_v39 = vpop.f32.mrb[103].mxu1 }
 0x24c   : > { %v5553_v42 = vadd.f32 %v4381_v31, %v4305_v25  ;;  %v4384_v49 = vadd.f32 %v4383_v39, %v4382_v35 }
 0x24e   : > { %v5555_v43 = vadd.f32 %v4384_v49, %v4308_v37 }
 0x24f   : > { %v4309_v24 = vpop.f32.mrb[104].mxu0 }
 0x250   : > { %v4385_v45 = vpop.f32.mrb[104].mxu1  ;;  %v4310_v51 = vpop.f32.mrb[105].mxu0 }
 0x251   : > { %v4311_v52 = vadd.f32 %v4310_v51, %v4309_v24  ;;  %v4386_v34 = vpop.f32.mrb[105].mxu1  ;;  %v4312_v26 = vpop.f32.mrb[106].mxu0 }
 0x252   : > { %v4387_v56 = vadd.f32 %v4386_v34, %v4385_v45  ;;  %v4388_v57 = vpop.f32.mrb[106].mxu1  ;;  %v4313_v61 = vpop.f32.mrb[107].mxu0 }
 0x253   : > { %v4314_v0 = vadd.f32 %v4313_v61, %v4312_v26  ;;  %v4389_v13 = vpop.f32.mrb[107].mxu1 }
 0x254   : > { %v5557_v58 = vadd.f32 %v4387_v56, %v4311_v52  ;;  %v4390_v1 = vadd.f32 %v4389_v13, %v4388_v57 }
 0x256   : > { %v5559_v47 = vadd.f32 %v4390_v1, %v4314_v0 }
 0x257   : > { %v4315_v3 = vpop.f32.mrb[108].mxu0 }
 0x258   : > { %v4391_v60 = vpop.f32.mrb[108].mxu1  ;;  %v4316_v50 = vpop.f32.mrb[109].mxu0 }
 0x259   : > { %v4317_v14 = vadd.f32 %v4316_v50, %v4315_v3  ;;  %v4392_v15 = vpop.f32.mrb[109].mxu1  ;;  %v4318_v16 = vpop.f32.mrb[110].mxu0 }
 0x25a   : > { %v4393_v2 = vadd.f32 %v4392_v15, %v4391_v60  ;;  %v4394_v20 = vpop.f32.mrb[110].mxu1  ;;  %v4319_v23 = vpop.f32.mrb[111].mxu0 }
 0x25b   : > { %v4320_v8 = vadd.f32 %v4319_v23, %v4318_v16  ;;  %v4395_v25 = vpop.f32.mrb[111].mxu1 }
 0x25c   : > { %v5561_v22 = vadd.f32 %v4393_v2, %v4317_v14  ;;  %v4396_v10 = vadd.f32 %v4395_v25, %v4394_v20 }
 0x25e   : > { %v5563_v31 = vadd.f32 %v4396_v10, %v4320_v8 }
 0x25f   : > { %v4321_v35 = vpop.f32.mrb[112].mxu0 }
 0x260   : > { %v4397_v36 = vpop.f32.mrb[112].mxu1  ;;  %v4322_v37 = vpop.f32.mrb[113].mxu0 }
 0x261   : > { %v4323_v39 = vadd.f32 %v4322_v37, %v4321_v35  ;;  %v4398_v49 = vpop.f32.mrb[113].mxu1  ;;  %v4324_v24 = vpop.f32.mrb[114].mxu0 }
 0x262   : > { %v4399_v45 = vadd.f32 %v4398_v49, %v4397_v36  ;;  %v4400_v51 = vpop.f32.mrb[114].mxu1  ;;  %v4325_v52 = vpop.f32.mrb[115].mxu0 }
 0x263   : > { %v4326_v34 = vadd.f32 %v4325_v52, %v4324_v24  ;;  %v4401_v26 = vpop.f32.mrb[115].mxu1 }
 0x264   : > { %v5565_v56 = vadd.f32 %v4399_v45, %v4323_v39  ;;  %v4402_v57 = vadd.f32 %v4401_v26, %v4400_v51 }
 0x266   : > { %v5567_v61 = vadd.f32 %v4402_v57, %v4326_v34  ;;  %v5576_v57 = vld [vmem:[%s5739_s4] ss:$0 sm:$0xff] }
 0x267   : > { %v4327_v0 = vpop.f32.mrb[116].mxu0 }
 0x268   : > { %v4403_v13 = vpop.f32.mrb[116].mxu1  ;;  %v4328_v1 = vpop.f32.mrb[117].mxu0 }
 0x269   : > { %v4329_v3 = vadd.f32 %v4328_v1, %v4327_v0  ;;  %v4404_v60 = vpop.f32.mrb[117].mxu1  ;;  %v4330_v50 = vpop.f32.mrb[118].mxu0 }
 0x26a   : > { %v4405_v14 = vadd.f32 %v4404_v60, %v4403_v13  ;;  %v4406_v15 = vpop.f32.mrb[118].mxu1  ;;  %v4331_v16 = vpop.f32.mrb[119].mxu0 }
 0x26b   : > { %v4407_v2 = vpop.f32.mrb[119].mxu1 }
 0x26c   : > { %v5569_v20 = vadd.f32 %v4405_v14, %v4329_v3 }
 0x26f   : > { %v4425_v23 = vpop.f32.mrb[120].mxu0 }
 0x270   : > { %v4501_v8 = vpop.f32.mrb[120].mxu1  ;;  %v4426_v25 = vpop.f32.mrb[121].mxu0 }
 0x271   : > { %v4427_v10 = vadd.f32 %v4426_v25, %v4425_v23  ;;  %v4502_v35 = vpop.f32.mrb[121].mxu1  ;;  %v4428_v36 = vpop.f32.mrb[122].mxu0 }
 0x272   : > { %v4503_v37 = vadd.f32 %v4502_v35, %v4501_v8  ;;  %v4504_v39 = vpop.f32.mrb[122].mxu1  ;;  %v4429_v49 = vpop.f32.mrb[123].mxu0  ;;  %v5584_v8 = vld [vmem:[%s5740_s5] ss:$0 sm:$0xff] }
 0x273   : > { %v3035_v24 = vadd.f32 %v4427_v10, %v5533_v63  ;;  %v4430_v45 = vadd.f32 %v4429_v49, %v4428_v36  ;;  %v4505_v51 = vpop.f32.mrb[123].mxu1 }
 0x274   : > { %v4506_v52 = vadd.f32 %v4505_v51, %v4504_v39 }
 0x275   : > { %v3147_v34 = vadd.f32 %v4503_v37, %v3035_v24  ;;  %v3038_v26 = vadd.f32 %v4430_v45, %v5535_v48 }
 0x277   : > { %v3150_v0 = vadd.f32 %v4506_v52, %v3038_v26  ;;  %v4431_v13 = vpop.f32.mrb[124].mxu0  ;;  %v3224_v1 = vsub.f32 %v5475_v41, %v3147_v34 }
 0x278   : > { %v4507_v3 = vpop.f32.mrb[124].mxu1  ;;  %v4432_v60 = vpop.f32.mrb[125].mxu0 }
 0x279   : > { %v3225_v50 = vsub.f32 %v5479_v44, %v3150_v0  ;;  %v4433_v63 = vadd.f32 %v4432_v60, %v4431_v13  ;;  %v4508_v14 = vpop.f32.mrb[125].mxu1  ;;  %v4434_v15 = vpop.f32.mrb[126].mxu0  ;;  %v3250_v16 = vadd.f32 %v5576_v57, %v3224_v1 }
 0x27a   : > { %v4509_v2 = vadd.f32 %v4508_v14, %v4507_v3  ;;  %v4510_v48 = vpop.f32.mrb[126].mxu1  ;;  %v4435_v23 = vpop.f32.mrb[127].mxu0 }
 0x27b   : > { %v3043_v25 = vadd.f32 %v4433_v63, %v5537_v18  ;;  %v4436_v41 = vadd.f32 %v4435_v23, %v4434_v15  ;;  %v4511_v10 = vpop.f32.mrb[127].mxu1  ;;  %v3269_v35 = vand.u32 2147483647, %v3250_v16  ;;  %v3251_v44 = vadd.f32 %v5576_v57, %v3225_v50 }
 0x27c   : > { %v4512_v36 = vadd.f32 %v4511_v10, %v4510_v48 }
 0x27d   : > { %v3155_v37 = vadd.f32 %v4509_v2, %v3043_v25  ;;  %v3046_v39 = vadd.f32 %v4436_v41, %v5539_v19  ;;  %v3295_v49 = vmul.f32 %v5584_v8, %v3269_v35  ;;  %v3270_v24 = vand.u32 2147483647, %v3251_v44 }
 0x27f   : > { %v3158_v45 = vadd.f32 %v4512_v36, %v3046_v39  ;;  %v4437_v51 = vpop.f32.mrb[128].mxu0  ;;  %3314 = vadd.xlane.f32.xlu0 %v3295_v49  ;;  %v3226_v52 = vsub.f32 %v5483_v7, %v3155_v37  ;;  %v3296_v3 = vmul.f32 %v5584_v8, %v3270_v24 }
 0x280   : > { %v4513_v34 = vpop.f32.mrb[128].mxu1  ;;  %v4438_v26 = vpop.f32.mrb[129].mxu0 }
 0x281   : > { %v3227_v18 = vsub.f32 %v5486_v11, %v3158_v45  ;;  %v4439_v0 = vadd.f32 %v4438_v26, %v4437_v51  ;;  %v4514_v13 = vpop.f32.mrb[129].mxu1  ;;  %v4440_v1 = vpop.f32.mrb[130].mxu0  ;;  %v3252_v60 = vadd.f32 %v5576_v57, %v3226_v52 }
 0x282   : > { %v4515_v19 = vadd.f32 %v4514_v13, %v4513_v34  ;;  %v4516_v50 = vpop.f32.mrb[130].mxu1  ;;  %v4441_v63 = vpop.f32.mrb[131].mxu0 }
 0x283   : > { %v3051_v14 = vadd.f32 %v4439_v0, %v5541_v38  ;;  %v4442_v15 = vadd.f32 %v4441_v63, %v4440_v1  ;;  %v4517_v16 = vpop.f32.mrb[131].mxu1  ;;  %3316 = vadd.xlane.f32.xlu0 %v3296_v3  ;;  %v3271_v7 = vand.u32 2147483647, %v3252_v60  ;;  %v3253_v2 = vadd.f32 %v5576_v57, %v3227_v18 }
 0x284   : > { %v4518_v48 = vadd.f32 %v4517_v16, %v4516_v50 }
 0x285   : > { %v3163_v11 = vadd.f32 %v4515_v19, %v3051_v14  ;;  %v3054_v23 = vadd.f32 %v4442_v15, %v5543_v40  ;;  %v3297_v25 = vmul.f32 %v5584_v8, %v3271_v7  ;;  %v3272_v41 = vand.u32 2147483647, %v3253_v2 }
 0x287   : > { %v3228_v10 = vsub.f32 %v5489_v30, %v3163_v11  ;;  %v3166_v35 = vadd.f32 %v4518_v48, %v3054_v23  ;;  %v4443_v44 = vpop.f32.mrb[132].mxu0  ;;  %3318 = vadd.xlane.f32.xlu1 %v3297_v25  ;;  %v3298_v45 = vmul.f32 %v5584_v8, %v3272_v41 }
 0x288   : > { %v4519_v36 = vpop.f32.mrb[132].mxu1  ;;  %v4444_v38 = vpop.f32.mrb[133].mxu0 }
 0x289   : > { %v3229_v37 = vsub.f32 %v5492_v33, %v3166_v35  ;;  %v4445_v39 = vadd.f32 %v4444_v38, %v4443_v44  ;;  %v4520_v49 = vpop.f32.mrb[133].mxu1  ;;  %v4446_v24 = vpop.f32.mrb[134].mxu0  ;;  %v3254_v51 = vadd.f32 %v5576_v57, %v3228_v10 }
 0x28a   : > { %v4521_v40 = vadd.f32 %v4520_v49, %v4519_v36  ;;  %v4522_v52 = vpop.f32.mrb[134].mxu1  ;;  %v4447_v34 = vpop.f32.mrb[135].mxu0 }
 0x28b   : > { %v3059_v26 = vadd.f32 %v4445_v39, %v5545_v59  ;;  %v4448_v30 = vadd.f32 %v4447_v34, %v4446_v24  ;;  %v4523_v18 = vpop.f32.mrb[135].mxu1  ;;  %3320 = vadd.xlane.f32.xlu1 %v3298_v45  ;;  %v3273_v0 = vand.u32 2147483647, %v3254_v51  ;;  %v3255_v13 = vadd.f32 %v5576_v57, %v3229_v37 }
 0x28c   : > { %v4524_v1 = vadd.f32 %v4523_v18, %v4522_v52 }
 0x28d   : > { %v3171_v33 = vadd.f32 %v4521_v40, %v3059_v26  ;;  %v3062_v3 = vadd.f32 %v4448_v30, %v5547_v62  ;;  %v3299_v60 = vmul.f32 %v5584_v8, %v3273_v0  ;;  %v3274_v19 = vand.u32 2147483647, %v3255_v13 }
 0x28f   : > { %v3230_v50 = vsub.f32 %v5495_v55, %v3171_v33  ;;  %v3174_v63 = vadd.f32 %v4524_v1, %v3062_v3  ;;  %v4449_v14 = vpop.f32.mrb[136].mxu0  ;;  %3322 = vadd.xlane.f32.xlu0 %v3299_v60  ;;  %v3300_v59 = vmul.f32 %v5584_v8, %v3274_v19 }
 0x290   : > { %v4525_v15 = vpop.f32.mrb[136].mxu1  ;;  %v4450_v16 = vpop.f32.mrb[137].mxu0 }
 0x291   : > { %v3231_v7 = vsub.f32 %v5498_v46, %v3174_v63  ;;  %v4451_v2 = vadd.f32 %v4450_v16, %v4449_v14  ;;  %v4526_v48 = vpop.f32.mrb[137].mxu1  ;;  %v4452_v11 = vpop.f32.mrb[138].mxu0  ;;  %3324 = vadd.xlane.f32.xlu1 %v3300_v59  ;;  %v3256_v62 = vadd.f32 %v5576_v57, %v3230_v50 }
 0x292   : > { %v4527_v23 = vadd.f32 %v4526_v48, %v4525_v15  ;;  %v4528_v25 = vpop.f32.mrb[138].mxu1  ;;  %v4453_v41 = vpop.f32.mrb[139].mxu0 }
 0x293   : > { %v3067_v55 = vadd.f32 %v4451_v2, %v5549_v17  ;;  %v4454_v10 = vadd.f32 %v4453_v41, %v4452_v11  ;;  %v4529_v35 = vpop.f32.mrb[139].mxu1  ;;  %v3275_v44 = vand.u32 2147483647, %v3256_v62  ;;  %v3257_v36 = vadd.f32 %v5576_v57, %v3231_v7 }
 0x294   : > { %v4530_v38 = vadd.f32 %v4529_v35, %v4528_v25 }
 0x295   : > { %v3179_v37 = vadd.f32 %v4527_v23, %v3067_v55  ;;  %v3070_v46 = vadd.f32 %v4454_v10, %v5551_v21  ;;  %v3301_v39 = vmul.f32 %v5584_v8, %v3275_v44  ;;  %v3276_v49 = vand.u32 2147483647, %v3257_v36 }
 0x297   : > { %v3232_v24 = vsub.f32 %v5501_v9, %v3179_v37  ;;  %v3182_v45 = vadd.f32 %v4530_v38, %v3070_v46  ;;  %v4455_v51 = vpop.f32.mrb[140].mxu0  ;;  %3326 = vadd.xlane.f32.xlu0 %v3301_v39  ;;  %v3302_v40 = vmul.f32 %v5584_v8, %v3276_v49 }
 0x298   : > { %v4531_v17 = vpop.f32.mrb[140].mxu1  ;;  %v4456_v52 = vpop.f32.mrb[141].mxu0 }
 0x299   : > { %v3233_v34 = vsub.f32 %v5504_v12, %v3182_v45  ;;  %v4457_v26 = vadd.f32 %v4456_v52, %v4455_v51  ;;  %v4532_v30 = vpop.f32.mrb[141].mxu1  ;;  %v4458_v18 = vpop.f32.mrb[142].mxu0  ;;  %3328 = vadd.xlane.f32.xlu1 %v3302_v40  ;;  %v3258_v21 = vadd.f32 %v5576_v57, %v3232_v24 }
 0x29a   : > { %v4533_v0 = vadd.f32 %v4532_v30, %v4531_v17  ;;  %v4534_v13 = vpop.f32.mrb[142].mxu1  ;;  %v4459_v1 = vpop.f32.mrb[143].mxu0 }
 0x29b   : > { %v3075_v9 = vadd.f32 %v4457_v26, %v5553_v42  ;;  %v4460_v33 = vadd.f32 %v4459_v1, %v4458_v18  ;;  %v4535_v3 = vpop.f32.mrb[143].mxu1  ;;  %v3277_v60 = vand.u32 2147483647, %v3258_v21  ;;  %v3259_v19 = vadd.f32 %v5576_v57, %v3233_v34 }
 0x29c   : > { %v4536_v50 = vadd.f32 %v4535_v3, %v4534_v13 }
 0x29d   : > { %v3187_v63 = vadd.f32 %v4533_v0, %v3075_v9  ;;  %v3078_v12 = vadd.f32 %v4460_v33, %v5555_v43  ;;  %v3303_v14 = vmul.f32 %v5584_v8, %v3277_v60  ;;  %v3278_v59 = vand.u32 2147483647, %v3259_v19 }
 0x29f   : > { %v3234_v15 = vsub.f32 %v5507_v4, %v3187_v63  ;;  %v3190_v16 = vadd.f32 %v4536_v50, %v3078_v12  ;;  %v4461_v7 = vpop.f32.mrb[144].mxu0  ;;  %3330 = vadd.xlane.f32.xlu0 %v3303_v14  ;;  %v3304_v2 = vmul.f32 %v5584_v8, %v3278_v59 }
 0x2a0   : > { %v4537_v42 = vpop.f32.mrb[144].mxu1  ;;  %v4462_v48 = vpop.f32.mrb[145].mxu0 }
 0x2a1   : > { %v3235_v11 = vsub.f32 %v5510_v29, %v3190_v16  ;;  %v4463_v62 = vadd.f32 %v4462_v48, %v4461_v7  ;;  %v4538_v23 = vpop.f32.mrb[145].mxu1  ;;  %v4464_v25 = vpop.f32.mrb[146].mxu0  ;;  %3332 = vadd.xlane.f32.xlu1 %v3304_v2  ;;  %v3260_v43 = vadd.f32 %v5576_v57, %v3234_v15 }
 0x2a2   : > { %v4539_v41 = vadd.f32 %v4538_v23, %v4537_v42  ;;  %v4540_v55 = vpop.f32.mrb[146].mxu1  ;;  %v4465_v10 = vpop.f32.mrb[147].mxu0 }
 0x2a3   : > { %v3083_v4 = vadd.f32 %v4463_v62, %v5557_v58  ;;  %v4466_v35 = vadd.f32 %v4465_v10, %v4464_v25  ;;  %v4541_v44 = vpop.f32.mrb[147].mxu1  ;;  %v3279_v36 = vand.u32 2147483647, %v3260_v43  ;;  %v3261_v38 = vadd.f32 %v5576_v57, %v3235_v11 }
 0x2a4   : > { %v4542_v37 = vadd.f32 %v4541_v44, %v4540_v55 }
 0x2a5   : > { %v3195_v46 = vadd.f32 %v4539_v41, %v3083_v4  ;;  %v3086_v29 = vadd.f32 %v4466_v35, %v5559_v47  ;;  %v3305_v39 = vmul.f32 %v5584_v8, %v3279_v36  ;;  %v3280_v49 = vand.u32 2147483647, %v3261_v38 }
 0x2a7   : > { %v3236_v24 = vsub.f32 %v5513_v53, %v3195_v46  ;;  %v3198_v45 = vadd.f32 %v4542_v37, %v3086_v29  ;;  %v4467_v51 = vpop.f32.mrb[148].mxu0  ;;  %3334 = vadd.xlane.f32.xlu0 %v3305_v39  ;;  %v3306_v40 = vmul.f32 %v5584_v8, %v3280_v49 }
 0x2a8   : > { %v4543_v58 = vpop.f32.mrb[148].mxu1  ;;  %v4468_v17 = vpop.f32.mrb[149].mxu0 }
 0x2a9   : > { %v3237_v52 = vsub.f32 %v5516_v54, %v3198_v45  ;;  %v4469_v34 = vadd.f32 %v4468_v17, %v4467_v51  ;;  %v4544_v26 = vpop.f32.mrb[149].mxu1  ;;  %v4470_v30 = vpop.f32.mrb[150].mxu0  ;;  %3336 = vadd.xlane.f32.xlu1 %v3306_v40  ;;  %v3262_v47 = vadd.f32 %v5576_v57, %v3236_v24 }
 0x2aa   : > { %v4545_v18 = vadd.f32 %v4544_v26, %v4543_v58  ;;  %v4546_v21 = vpop.f32.mrb[150].mxu1  ;;  %v4471_v0 = vpop.f32.mrb[151].mxu0 }
 0x2ab   : > { %v3091_v53 = vadd.f32 %v4469_v34, %v5561_v22  ;;  %v4472_v13 = vadd.f32 %v4471_v0, %v4470_v30  ;;  %v4547_v1 = vpop.f32.mrb[151].mxu1  ;;  %v3281_v9 = vand.u32 2147483647, %v3262_v47  ;;  %v3263_v33 = vadd.f32 %v5576_v57, %v3237_v52  ;;  %v5657_v0 = vld [vmem:[#allocation2] ss:$0 sm:$0xff] }
 0x2ac   : > { %v4548_v3 = vadd.f32 %v4547_v1, %v4546_v21 }
 0x2ad   : > { %v3203_v60 = vadd.f32 %v4545_v18, %v3091_v53  ;;  %v3094_v54 = vadd.f32 %v4472_v13, %v5563_v31  ;;  %v3307_v19 = vmul.f32 %v5584_v8, %v3281_v9  ;;  %v3282_v50 = vand.u32 2147483647, %v3263_v33 }
 0x2af   : > { %v3238_v63 = vsub.f32 %v5519_v5, %v3203_v60  ;;  %v3206_v12 = vadd.f32 %v4548_v3, %v3094_v54  ;;  %v4473_v14 = vpop.f32.mrb[152].mxu0  ;;  %3338 = vadd.xlane.f32.xlu0 %v3307_v19  ;;  %v3308_v59 = vmul.f32 %v5584_v8, %v3282_v50 }
 0x2b0   : > { %v4549_v22 = vpop.f32.mrb[152].mxu1  ;;  %v4474_v15 = vpop.f32.mrb[153].mxu0 }
 0x2b1   : > { %v3239_v16 = vsub.f32 %v5522_v6, %v3206_v12  ;;  %v4475_v7 = vadd.f32 %v4474_v15, %v4473_v14  ;;  %v4550_v2 = vpop.f32.mrb[153].mxu1  ;;  %v4476_v42 = vpop.f32.mrb[154].mxu0  ;;  %3340 = vadd.xlane.f32.xlu1 %v3308_v59  ;;  %v3264_v31 = vadd.f32 %v5576_v57, %v3238_v63 }
 0x2b2   : > { %v4551_v48 = vadd.f32 %v4550_v2, %v4549_v22  ;;  %v4552_v11 = vpop.f32.mrb[154].mxu1  ;;  %v4477_v62 = vpop.f32.mrb[155].mxu0 }
 0x2b3   : > { %v3099_v5 = vadd.f32 %v4475_v7, %v5565_v56  ;;  %v4478_v23 = vadd.f32 %v4477_v62, %v4476_v42  ;;  %v4553_v25 = vpop.f32.mrb[155].mxu1  ;;  %v3283_v43 = vand.u32 2147483647, %v3264_v31  ;;  %v3265_v41 = vadd.f32 %v5576_v57, %v3239_v16 }
 0x2b4   : > { %v4554_v55 = vadd.f32 %v4553_v25, %v4552_v11 }
 0x2b5   : > { %v3211_v10 = vadd.f32 %v4551_v48, %v3099_v5  ;;  %v3102_v6 = vadd.f32 %v4478_v23, %v5567_v61  ;;  %v3309_v4 = vmul.f32 %v5584_v8, %v3283_v43  ;;  %v3284_v35 = vand.u32 2147483647, %v3265_v41 }
 0x2b7   : > { %v3240_v44 = vsub.f32 %v5525_v27, %v3211_v10  ;;  %v3214_v36 = vadd.f32 %v4554_v55, %v3102_v6  ;;  %v4479_v38 = vpop.f32.mrb[156].mxu0  ;;  %3342 = vadd.xlane.f32.xlu0 %v3309_v4  ;;  %v3310_v37 = vmul.f32 %v5584_v8, %v3284_v35 }
 0x2b8   : > { %v4555_v56 = vpop.f32.mrb[156].mxu1  ;;  %v4480_v46 = vpop.f32.mrb[157].mxu0 }
 0x2b9   : > { %v3241_v29 = vsub.f32 %v5528_v28, %v3214_v36  ;;  %v4481_v39 = vadd.f32 %v4480_v46, %v4479_v38  ;;  %v4556_v49 = vpop.f32.mrb[157].mxu1  ;;  %v4482_v24 = vpop.f32.mrb[158].mxu0  ;;  %3344 = vadd.xlane.f32.xlu1 %v3310_v37  ;;  %v3266_v61 = vadd.f32 %v5576_v57, %v3240_v44 }
 0x2ba   : > { %v4557_v45 = vadd.f32 %v4556_v49, %v4555_v56  ;;  %v4558_v51 = vpop.f32.mrb[158].mxu1  ;;  %v4483_v40 = vpop.f32.mrb[159].mxu0 }
 0x2bb   : > { %v3107_v27 = vadd.f32 %v4481_v39, %v5569_v20  ;;  %v4559_v58 = vpop.f32.mrb[159].mxu1  ;;  %v3285_v17 = vand.u32 2147483647, %v3266_v61  ;;  %v3267_v52 = vadd.f32 %v5576_v57, %v3241_v29 }
 0x2bd   : > { %v3219_v34 = vadd.f32 %v4557_v45, %v3107_v27  ;;  %v3311_v26 = vmul.f32 %v5584_v8, %v3285_v17  ;;  %v3286_v30 = vand.u32 2147483647, %v3267_v52 }
 0x2bf   : > { %v3242_v28 = vsub.f32 %v5531_v32, %v3219_v34  ;;  %3346 = vadd.xlane.f32.xlu0 %v3311_v26  ;;  %v3312_v47 = vmul.f32 %v5584_v8, %v3286_v30 }
 0x2c1   : > { %3348 = vadd.xlane.f32.xlu1 %v3312_v47  ;;  %v3268_v18 = vadd.f32 %v5576_v57, %v3242_v28 }
 0x2c3   : > { %v3287_v21 = vand.u32 2147483647, %v3268_v18 }
 0x2c5   : > { %v3313_v20 = vmul.f32 %v5584_v8, %v3287_v21 }
 0x2c7   : > { %3350 = vadd.xlane.f32.xlu0 %v3313_v20 }
 0x30c   : > { %v3315_v53 = vpop.xlane.xlu0 %3314 }
 0x30d   : > { %v3359_v13 = vadd.f32 %v5657_v0, %v3315_v53 }
 0x30f   : > { %v3926_v1 = vmul.f32 -1.442695, %v3359_v13 }
 0x310   : > { %v3317_v9 = vpop.xlane.xlu0 %3316 }
 0x311   : > { %4777 = vpow2.f32 %v3926_v1  ;;  %v3360_v32 = vadd.f32 %v5657_v0, %v3317_v9 }
 0x313   : > { %v3927_v33 = vmul.f32 -1.442695, %v3360_v32 }
 0x314   : > { %v3319_v3 = vpop.xlane.xlu1 %3318 }
 0x315   : > { %4779 = vpow2.f32 %v3927_v33  ;;  %v3361_v60 = vadd.f32 %v5657_v0, %v3319_v3 }
 0x317   : > { %v3928_v57 = vmul.f32 -1.442695, %v3361_v60 }
 0x318   : > { %v3321_v54 = vpop.xlane.xlu1 %3320 }
 0x319   : > { %4781 = vpow2.f32 %v3928_v57  ;;  %v3362_v8 = vadd.f32 %v5657_v0, %v3321_v54 }
 0x31b   : > { %v4778_v19 = vpop.eup %4777  ;;  %v3929_v50 = vmul.f32 -1.442695, %v3362_v8 }
 0x31c   : > { %v3435_v63 = vadd.f32 1.0, %v4778_v19  ;;  %v3323_v12 = vpop.xlane.xlu0 %3322 }
 0x31d   : > { %4783 = vpow2.f32 %v3929_v50  ;;  %v3363_v14 = vadd.f32 %v5657_v0, %v3323_v12 }
 0x31e   : > { %4785 = vrcp.f32 %v3435_v63  ;;  %v3325_v59 = vpop.xlane.xlu1 %3324 }
 0x31f   : > { %v4780_v22 = vpop.eup %4779  ;;  %v3930_v15 = vmul.f32 -1.442695, %v3363_v14  ;;  %v3364_v16 = vadd.f32 %v5657_v0, %v3325_v59 }
 0x320   : > { %v3436_v7 = vadd.f32 1.0, %v4780_v22 }
 0x321   : > { %4787 = vpow2.f32 %v3930_v15  ;;  %v3931_v2 = vmul.f32 -1.442695, %v3364_v16 }
 0x322   : > { %4789 = vrcp.f32 %v3436_v7 }
 0x323   : > { %v4782_v42 = vpop.eup %4781  ;;  %4791 = vpow2.f32 %v3931_v2 }
 0x324   : > { %v3437_v31 = vadd.f32 1.0, %v4782_v42  ;;  %v3327_v48 = vpop.xlane.xlu0 %3326 }
 0x325   : > { %v3365_v11 = vadd.f32 %v5657_v0, %v3327_v48 }
 0x326   : > { %4793 = vrcp.f32 %v3437_v31  ;;  %v3329_v62 = vpop.xlane.xlu1 %3328 }
 0x327   : > { %v4784_v5 = vpop.eup %4783  ;;  %v3932_v23 = vmul.f32 -1.442695, %v3365_v11  ;;  %v3366_v25 = vadd.f32 %v5657_v0, %v3329_v62 }
 0x328   : > { %v4786_v43 = vpop.eup %4785  ;;  %v3438_v41 = vadd.f32 1.0, %v4784_v5 }
 0x329   : > { %3493 = vst.msk [vmem:[%s5670_s16] sm:$0xff] %vm3492_vm0, %v4786_v43  ;;  %4795 = vpow2.f32 %v3932_v23  ;;  %v3933_v55 = vmul.f32 -1.442695, %v3366_v25 }
 0x32a   : > { %4797 = vrcp.f32 %v3438_v41 }
 0x32b   : > { %v4788_v10 = vpop.eup %4787  ;;  %4799 = vpow2.f32 %v3933_v55 }
 0x32c   : > { %v4790_v6 = vpop.eup %4789  ;;  %v3439_v4 = vadd.f32 1.0, %v4788_v10  ;;  %v3331_v35 = vpop.xlane.xlu0 %3330 }
 0x32d   : > { %v4792_v44 = vpop.eup %4791  ;;  %3494 = vst.msk [vmem:[%s5670_s16 + $0x8] sm:$0xff] %vm3492_vm0, %v4790_v6  ;;  %v3367_v36 = vadd.f32 %v5657_v0, %v3331_v35 }
 0x32e   : > { %4801 = vrcp.f32 %v3439_v4  ;;  %v3440_v38 = vadd.f32 1.0, %v4792_v44  ;;  %v3333_v37 = vpop.xlane.xlu1 %3332 }
 0x32f   : > { %v3934_v56 = vmul.f32 -1.442695, %v3367_v36  ;;  %v3368_v46 = vadd.f32 %v5657_v0, %v3333_v37 }
 0x330   : > { %v4794_v29 = vpop.eup %4793  ;;  %4803 = vrcp.f32 %v3440_v38 }
 0x331   : > { %3495 = vst.msk [vmem:[%s5670_s16 + $0x10] sm:$0xff] %vm3492_vm0, %v4794_v29  ;;  %4805 = vpow2.f32 %v3934_v56  ;;  %v3935_v39 = vmul.f32 -1.442695, %v3368_v46 }
 0x333   : > { %v4796_v49 = vpop.eup %4795  ;;  %4807 = vpow2.f32 %v3935_v39 }
 0x334   : > { %v4798_v24 = vpop.eup %4797  ;;  %v3441_v61 = vadd.f32 1.0, %v4796_v49  ;;  %v3335_v45 = vpop.xlane.xlu0 %3334 }
 0x335   : > { %v4800_v51 = vpop.eup %4799  ;;  %3496 = vst.msk [vmem:[%s5670_s16 + $0x18] sm:$0xff] %vm3492_vm0, %v4798_v24  ;;  %v3369_v40 = vadd.f32 %v5657_v0, %v3335_v45 }
 0x336   : > { %4809 = vrcp.f32 %v3441_v61  ;;  %v3442_v27 = vadd.f32 1.0, %v4800_v51  ;;  %v3337_v58 = vpop.xlane.xlu1 %3336 }
 0x337   : > { %v3936_v17 = vmul.f32 -1.442695, %v3369_v40  ;;  %v3370_v52 = vadd.f32 %v5657_v0, %v3337_v58 }
 0x338   : > { %v4802_v34 = vpop.eup %4801  ;;  %4811 = vrcp.f32 %v3442_v27 }
 0x339   : > { %3497 = vst.msk [vmem:[%s5670_s16 + $0x20] sm:$0xff] %vm3492_vm0, %v4802_v34  ;;  %4813 = vpow2.f32 %v3936_v17  ;;  %v3937_v26 = vmul.f32 -1.442695, %v3370_v52 }
 0x33a   : > { %v4804_v30 = vpop.eup %4803 }
 0x33b   : > { %v4806_v28 = vpop.eup %4805  ;;  %3498 = vst.msk [vmem:[%s5670_s16 + $0x28] sm:$0xff] %vm3492_vm0, %v4804_v30  ;;  %4815 = vpow2.f32 %v3937_v26 }
 0x33c   : > { %v3443_v47 = vadd.f32 1.0, %v4806_v28  ;;  %v3339_v18 = vpop.xlane.xlu0 %3338 }
 0x33d   : > { %v4808_v21 = vpop.eup %4807  ;;  %v3371_v20 = vadd.f32 %v5657_v0, %v3339_v18 }
 0x33e   : > { %4817 = vrcp.f32 %v3443_v47  ;;  %v3444_v53 = vadd.f32 1.0, %v4808_v21  ;;  %v3341_v13 = vpop.xlane.xlu1 %3340 }
 0x33f   : > { %v3938_v1 = vmul.f32 -1.442695, %v3371_v20  ;;  %v3372_v9 = vadd.f32 %v5657_v0, %v3341_v13 }
 0x340   : > { %v4810_v32 = vpop.eup %4809  ;;  %4819 = vrcp.f32 %v3444_v53 }
 0x341   : > { %3499 = vst.msk [vmem:[%s5670_s16 + $0x30] sm:$0xff] %vm3492_vm0, %v4810_v32  ;;  %4821 = vpow2.f32 %v3938_v1  ;;  %v3939_v33 = vmul.f32 -1.442695, %v3372_v9 }
 0x342   : > { %v4812_v3 = vpop.eup %4811 }
 0x343   : > { %v4814_v60 = vpop.eup %4813  ;;  %3500 = vst.msk [vmem:[%s5670_s16 + $0x38] sm:$0xff] %vm3492_vm0, %v4812_v3  ;;  %4823 = vpow2.f32 %v3939_v33 }
 0x344   : > { %v3445_v57 = vadd.f32 1.0, %v4814_v60  ;;  %v3343_v54 = vpop.xlane.xlu0 %3342 }
 0x345   : > { %v4816_v8 = vpop.eup %4815  ;;  %v3373_v19 = vadd.f32 %v5657_v0, %v3343_v54 }
 0x346   : > { %4825 = vrcp.f32 %v3445_v57  ;;  %v3446_v50 = vadd.f32 1.0, %v4816_v8  ;;  %v3345_v63 = vpop.xlane.xlu1 %3344 }
 0x347   : > { %v3940_v12 = vmul.f32 -1.442695, %v3373_v19  ;;  %v3374_v14 = vadd.f32 %v5657_v0, %v3345_v63 }
 0x348   : > { %v4818_v59 = vpop.eup %4817  ;;  %4827 = vrcp.f32 %v3446_v50 }
 0x349   : > { %3501 = vst.msk [vmem:[%s5670_s16 + $0x40] sm:$0xff] %vm3492_vm0, %v4818_v59  ;;  %4829 = vpow2.f32 %v3940_v12  ;;  %v3941_v22 = vmul.f32 -1.442695, %v3374_v14 }
 0x34a   : > { %v4820_v15 = vpop.eup %4819 }
 0x34b   : > { %v4822_v16 = vpop.eup %4821  ;;  %3502 = vst.msk [vmem:[%s5670_s16 + $0x48] sm:$0xff] %vm3492_vm0, %v4820_v15  ;;  %4831 = vpow2.f32 %v3941_v22 }
 0x34c   : > { %v3447_v7 = vadd.f32 1.0, %v4822_v16  ;;  %v3347_v2 = vpop.xlane.xlu0 %3346 }
 0x34d   : > { %v4824_v42 = vpop.eup %4823  ;;  %v3375_v31 = vadd.f32 %v5657_v0, %v3347_v2 }
 0x34e   : > { %4833 = vrcp.f32 %v3447_v7  ;;  %v3448_v48 = vadd.f32 1.0, %v4824_v42  ;;  %v3349_v11 = vpop.xlane.xlu1 %3348 }
 0x34f   : > { %v3942_v62 = vmul.f32 -1.442695, %v3375_v31  ;;  %v3376_v5 = vadd.f32 %v5657_v0, %v3349_v11 }
 0x350   : > { %v4826_v23 = vpop.eup %4825  ;;  %4835 = vrcp.f32 %v3448_v48 }
 0x351   : > { %3503 = vst.msk [vmem:[%s5670_s16 + $0x50] sm:$0xff] %vm3492_vm0, %v4826_v23  ;;  %4837 = vpow2.f32 %v3942_v62  ;;  %v3943_v25 = vmul.f32 -1.442695, %v3376_v5 }
 0x352   : > { %v4828_v43 = vpop.eup %4827 }
 0x353   : > { %v4830_v41 = vpop.eup %4829  ;;  %3504 = vst.msk [vmem:[%s5670_s16 + $0x58] sm:$0xff] %vm3492_vm0, %v4828_v43  ;;  %4839 = vpow2.f32 %v3943_v25 }
 0x354   : > { %v3449_v55 = vadd.f32 1.0, %v4830_v41  ;;  %v3351_v10 = vpop.xlane.xlu0 %3350 }
 0x355   : > { %v4832_v6 = vpop.eup %4831  ;;  %v3377_v4 = vadd.f32 %v5657_v0, %v3351_v10 }
 0x356   : > { %4841 = vrcp.f32 %v3449_v55  ;;  %v3450_v35 = vadd.f32 1.0, %v4832_v6 }
 0x357   : > { %v3944_v44 = vmul.f32 -1.442695, %v3377_v4 }
 0x358   : > { %v4834_v36 = vpop.eup %4833  ;;  %4843 = vrcp.f32 %v3450_v35 }
 0x359   : > { %3505 = vst.msk [vmem:[%s5670_s16 + $0x60] sm:$0xff] %vm3492_vm0, %v4834_v36  ;;  %4845 = vpow2.f32 %v3944_v44 }
 0x35a   : > { %v4836_v38 = vpop.eup %4835 }
 0x35b   : > { %v4838_v37 = vpop.eup %4837  ;;  %3506 = vst.msk [vmem:[%s5670_s16 + $0x68] sm:$0xff] %vm3492_vm0, %v4836_v38 }
 0x35c   : > { %v3451_v56 = vadd.f32 1.0, %v4838_v37 }
 0x35d   : > { %v4840_v46 = vpop.eup %4839 }
 0x35e   : > { %4847 = vrcp.f32 %v3451_v56  ;;  %v3452_v0 = vadd.f32 1.0, %v4840_v46 }
 0x360   : > { %v4842_v29 = vpop.eup %4841  ;;  %4849 = vrcp.f32 %v3452_v0 }
 0x361   : > { %3507 = vst.msk [vmem:[%s5670_s16 + $0x70] sm:$0xff] %vm3492_vm0, %v4842_v29 }
 0x362   : > { %v4844_v39 = vpop.eup %4843 }
 0x363   : > { %v4846_v49 = vpop.eup %4845  ;;  %3508 = vst.msk [vmem:[%s5670_s16 + $0x78] sm:$0xff] %vm3492_vm0, %v4844_v39 }
 0x364   : > { %v3453_v24 = vadd.f32 1.0, %v4846_v49 }
 0x366   : > { %4851 = vrcp.f32 %v3453_v24 }
 0x368   : > { %v4848_v61 = vpop.eup %4847 }
 0x369   : > { %3509 = vst.msk [vmem:[%s5670_s16 + $0x80] sm:$0xff] %vm3492_vm0, %v4848_v61 }
 0x36a   : > { %v4850_v45 = vpop.eup %4849 }
 0x36b   : > { %3510 = vst.msk [vmem:[%s5670_s16 + $0x88] sm:$0xff] %vm3492_vm0, %v4850_v45 }
 0x370   : > { %v4852_v51 = vpop.eup %4851 }
 0x371   : > { %3511 = vst.msk [vmem:[%s5670_s16 + $0x90] sm:$0xff] %vm3492_vm0, %v4852_v51 }
 0x372 PF: > { %p23_p12 = scmp.ge.s32.totalorder %s5161_s20, 4   ;;  %s5756_s26 = smov %s5007_s27 }
 0x373   : > { %s5757_s27 = smov %s5011_s28  ;;  %s5758_s28 = smov %s5172_s25 }
 0x374   : > { %s5759_s29 = smov %s5161_s20  ;;  %25 = sbr.rel (!%p23_p12) target bundleno = 9 (0x9), region = 109 }
 0x37b   :  { %3534 = vsyncpa [#allocation4], 1 }
 0x37c   :  { %3536 = vsyncpa [#allocation4 + $0x1], 1 }
 0x37d   :  { %3537 = vsyncpa [#allocation6], 1 }
 0x37e   :  { %3539 = vsyncpa [#allocation6 + $0x1], 1 }
 0x37f   :  { %3540 = vsyncpa [#allocation9], 1 }

</bundles_post_ra>
